<compile_context>
chip_gen: v7x
topology: tpu7x:2x2x1
jax: 0.10.0
libtpu: 0.0.40
codegen_flags: <defaults>
</compile_context>

<pallas_src>
import functools

import jax
import jax.numpy as jnp
import numpy as np
from jax import lax
from jax.experimental import pallas as pl
from jax.experimental.pallas import tpu as pltpu


def _round_up(v, m):
    return ((v + m - 1) // m) * m


def _lstm_fc_kernel(x_ref, wih_ref, whh_ref, b_ref, fcb_ref, fcw_hbm_ref,
                    out_ref, fcw_vmem, fcw_sem, *, batch, seq_len, hidden):
    B, T, H = batch, seq_len, hidden
    G = 4 * H

    # Kick off the fc-weight HBM->VMEM DMA immediately; it is only needed by
    # the (off-critical-path) fused fc accumulation, so it hides behind the
    # input projection and the first recurrence step.
    fcw_copy = pltpu.make_async_copy(fcw_hbm_ref, fcw_vmem, fcw_sem)
    fcw_copy.start()

    # ---- Phase 1: input projection for ALL timesteps as one MXU matmul,
    # hoisted off the serial recurrence path; kept as a value (no VMEM trip).
    xproj = (jnp.dot(x_ref[...], wih_ref[...],
                     preferred_element_type=jnp.float32)
             + b_ref[...])                       # (B*T, 4H), rows batch-major
    xproj = xproj.reshape(B, T, G)               # layout-preserving regroup

    # ---- Phase 2: recurrence, fully unrolled (T small & static), with the fc
    # layer fused in.  out_acc does not feed h_{t+1}, so the per-step fc matmul
    # executes in the shadow of the gate nonlinearities.
    h = jnp.zeros((B, H), jnp.float32)
    c = jnp.zeros((B, H), jnp.float32)
    out_acc = jnp.zeros(out_ref.shape, jnp.float32)
    for t in range(T):
        gates = xproj[:, t, :] + jnp.dot(h, whh_ref[...],
                                         preferred_element_type=jnp.float32)
        # PyTorch gate order [i, f, g, o]; H-lane sub-vreg slices (XLU slot).
        i_g = jax.nn.sigmoid(gates[:, 0 * H:1 * H])
        f_g = jax.nn.sigmoid(gates[:, 1 * H:2 * H])
        g_g = jnp.tanh(gates[:, 2 * H:3 * H])
        o_g = jax.nn.sigmoid(gates[:, 3 * H:4 * H])
        c = f_g * c + i_g * g_g
        h = o_g * jnp.tanh(c)
        if t == 0:
            fcw_copy.wait()      # first fc-weight use; DMA has been in flight
        out_acc = out_acc + jnp.dot(h, fcw_vmem[t * H:(t + 1) * H, :],
                                    preferred_element_type=jnp.float32)

    # ---- Phase 3: just the bias add + lane-dense store.
    out_ref[...] = (out_acc + fcb_ref[...]).astype(out_ref.dtype)


def simple_rl_lstm_forward(x, params):
    """x: (B, T, E) float32 (batch_first). Returns (B, output_size) float32."""
    B, T, E = x.shape
    w_ih, w_hh, b_ih, b_hh, fc_w, fc_b = (
        params["w_ih"], params["w_hh"], params["b_ih"], params["b_hh"],
        params["fc_w"], params["fc_b"])
    H = w_hh.shape[1]
    O = fc_w.shape[0]
    assert w_ih.shape == (4 * H, E) and fc_w.shape[1] == T * H

    G = 4 * H                       # gate width (lane axis of the recurrence)
    Op = _round_up(O, 128)          # lane-dense fc output width

    # Unpadded weight layouts (only the fc OUTPUT axis is padded to 128 lanes).
    wih_p = jnp.transpose(w_ih)                          # (E, 4H)
    whh_p = jnp.transpose(w_hh)                          # (H, 4H)
    bias_p = (b_ih + b_hh).reshape(1, G)                 # (1, 4H)
    fcw_p = jnp.pad(jnp.transpose(fc_w), ((0, 0), (0, Op - O)))   # (T*H, Op)
    fcb_p = jnp.pad(fc_b.reshape(1, O), ((0, 0), (0, Op - O)))    # (1, Op)

    x2d = x.reshape(B * T, E)       # free contiguous reshape; no transpose

    kernel = functools.partial(_lstm_fc_kernel, batch=B, seq_len=T, hidden=H)

    out_p = pl.pallas_call(
        kernel,
        out_shape=jax.ShapeDtypeStruct((B, Op), jnp.float32),
        grid_spec=pltpu.PrefetchScalarGridSpec(
            num_scalar_prefetch=0,
            grid=(1,),
            in_specs=[
                pl.BlockSpec((B * T, E), lambda i: (0, 0)),   # x, all steps
                pl.BlockSpec((E, G), lambda i: (0, 0)),        # W_ih^T
                pl.BlockSpec((H, G), lambda i: (0, 0)),        # W_hh^T
                pl.BlockSpec((1, G), lambda i: (0, 0)),        # b_ih + b_hh
                pl.BlockSpec((1, Op), lambda i: (0, 0)),       # fc bias
                pl.BlockSpec(memory_space=pl.ANY),             # fc weight (manual DMA)
            ],
            out_specs=pl.BlockSpec((B, Op), lambda i: (0, 0)),
            scratch_shapes=[
                pltpu.VMEM((T * H, Op), jnp.float32),          # fc weight buffer
                pltpu.SemaphoreType.DMA(()),                   # its DMA semaphore
            ],
        ),
        compiler_params=pltpu.CompilerParams(
            dimension_semantics=("arbitrary",),
            vmem_limit_bytes=8 * 1024 * 1024),
    )(x2d, wih_p, whh_p, bias_p, fcb_p, fcw_p)

    return out_p[:, :O]


def reference_forward(x, params):
    """Pure-JAX reference matching PyTorch nn.LSTM + nn.Linear semantics."""
    w_ih, w_hh, b_ih, b_hh, fc_w, fc_b = (
        params["w_ih"], params["w_hh"], params["b_ih"], params["b_hh"],
        params["fc_w"], params["fc_b"])
    B, T, E = x.shape
    H = w_hh.shape[1]

    def step(carry, x_t):
        h, c = carry
        gates = x_t @ w_ih.T + b_ih + h @ w_hh.T + b_hh
        i = jax.nn.sigmoid(gates[:, 0 * H:1 * H])
        f = jax.nn.sigmoid(gates[:, 1 * H:2 * H])
        g = jnp.tanh(gates[:, 2 * H:3 * H])
        o = jax.nn.sigmoid(gates[:, 3 * H:4 * H])
        c_new = f * c + i * g
        h_new = o * jnp.tanh(c_new)
        return (h_new, c_new), h_new

    h0 = jnp.zeros((B, H), jnp.float32)
    c0 = jnp.zeros((B, H), jnp.float32)
    (_, _), hs = lax.scan(step, (h0, c0), jnp.transpose(x, (1, 0, 2)))
    lstm_out = jnp.transpose(hs, (1, 0, 2))          # (B, T, H)
    flat = lstm_out.reshape(B, -1)                   # (B, T*H)
    return flat @ fc_w.T + fc_b


def make_params(key, embedding_dim, hidden_dim, output_size, sequence_length):
    """Deterministic uniform init mimicking PyTorch's default LSTM/Linear init."""
    k = jax.random.split(key, 6)
    s_lstm = 1.0 / np.sqrt(hidden_dim)
    s_fc = 1.0 / np.sqrt(hidden_dim * sequence_length)
    u = lambda kk, shape, s: jax.random.uniform(
        kk, shape, jnp.float32, minval=-s, maxval=s)
    return {
        "w_ih": u(k[0], (4 * hidden_dim, embedding_dim), s_lstm),
        "w_hh": u(k[1], (4 * hidden_dim, hidden_dim), s_lstm),
        "b_ih": u(k[2], (4 * hidden_dim,), s_lstm),
        "b_hh": u(k[3], (4 * hidden_dim,), s_lstm),
        "fc_w": u(k[4], (output_size, hidden_dim * sequence_length), s_fc),
        "fc_b": u(k[5], (output_size,), s_fc),
    }


if __name__ == "__main__":
    B, T, E, H, O = 2, 8, 16, 32, 8   # batch, seq, embedding, hidden, output

    key = jax.random.PRNGKey(0)
    kx, kp = jax.random.split(key)
    x = jax.random.normal(kx, (B, T, E), jnp.float32)
    params = make_params(kp, E, H, O, T)

    out = simple_rl_lstm_forward(x, params)
    out = jax.block_until_ready(out)

    ref = reference_forward(x, params)
    np.testing.assert_allclose(np.asarray(out), np.asarray(ref),
                               rtol=1e-4, atol=1e-4)
    print("KERNEL_OK")
</pallas_src>

<mosaic_0001>
module attributes {stable_mosaic.version = 11 : i64} {
  func.func @_lstm_fc_kernel(%arg0: i32, %arg1: memref<16x16xf32, #tpu.memory_space<vmem>>, %arg2: memref<16x128xf32, #tpu.memory_space<vmem>>, %arg3: memref<32x128xf32, #tpu.memory_space<vmem>>, %arg4: memref<1x128xf32, #tpu.memory_space<vmem>>, %arg5: memref<1x128xf32, #tpu.memory_space<vmem>>, %arg6: memref<256x128xf32, #tpu.memory_space<any>>, %arg7: memref<2x128xf32, #tpu.memory_space<vmem>>, %arg8: memref<256x128xf32, #tpu.memory_space<vmem>>, %arg9: memref<!tpu.dma_semaphore, #tpu.memory_space<semaphore_mem>>) attributes {dimension_semantics = [#tpu.dimension_semantics<arbitrary>], iteration_bounds = array<i64: 1>, scalar_prefetch = 0 : i64, scratch_operands = 2 : i64, tpu.core_type = #tpu.core_type<tc>, window_params = [{pipeline_mode = #tpu.pipeline_mode<synchronous>, transform_indices = @transform_0, window_bounds = array<i64: 16, 16>}, {pipeline_mode = #tpu.pipeline_mode<synchronous>, transform_indices = @transform_1, window_bounds = array<i64: 16, 128>}, {pipeline_mode = #tpu.pipeline_mode<synchronous>, transform_indices = @transform_2, window_bounds = array<i64: 32, 128>}, {pipeline_mode = #tpu.pipeline_mode<synchronous>, transform_indices = @transform_3, window_bounds = array<i64: 1, 128>}, {pipeline_mode = #tpu.pipeline_mode<synchronous>, transform_indices = @transform_4, window_bounds = array<i64: 1, 128>}, {}, {pipeline_mode = #tpu.pipeline_mode<synchronous>, transform_indices = @transform_6, window_bounds = array<i64: 2, 128>}]} {
    tpu.enqueue_dma source(%arg6 : memref<256x128xf32, #tpu.memory_space<any>>) target(%arg8 : memref<256x128xf32, #tpu.memory_space<vmem>>) target_semaphore(%arg9 : memref<!tpu.dma_semaphore, #tpu.memory_space<semaphore_mem>>)
    %c0 = arith.constant 0 : index
    %c0_0 = arith.constant 0 : index
    %0 = vector.load %arg1[%c0, %c0_0] : memref<16x16xf32, #tpu.memory_space<vmem>>, vector<16x16xf32>
    %c0_1 = arith.constant 0 : index
    %c0_2 = arith.constant 0 : index
    %1 = vector.load %arg2[%c0_1, %c0_2] : memref<16x128xf32, #tpu.memory_space<vmem>>, vector<16x128xf32>
    %cst = arith.constant dense<0.000000e+00> : vector<16x128xf32>
    %2 = tpu.matmul %0, %1, %cst {dimension_numbers = #tpu.dot_dimension_numbers<[1], [0], [0], [1], [0, 0, 1, 1], [], []>} : vector<16x16xf32>, vector<16x128xf32>, vector<16x128xf32> -> vector<16x128xf32>
    %c0_3 = arith.constant 0 : index
    %c0_4 = arith.constant 0 : index
    %3 = vector.load %arg4[%c0_3, %c0_4] : memref<1x128xf32, #tpu.memory_space<vmem>>, vector<1x128xf32>
    %4 = vector.broadcast %3 : vector<1x128xf32> to vector<16x128xf32>
    %5 = arith.addf %2, %4 : vector<16x128xf32>
    %6 = vector.shape_cast %5 : vector<16x128xf32> to vector<2x8x128xf32>
    %cst_5 = arith.constant 0.000000e+00 : f32
    %7 = vector.broadcast %cst_5 : f32 to vector<2x32xf32>
    %cst_6 = arith.constant 0.000000e+00 : f32
    %8 = vector.broadcast %cst_6 : f32 to vector<2x32xf32>
    %cst_7 = arith.constant 0.000000e+00 : f32
    %9 = vector.broadcast %cst_7 : f32 to vector<2x128xf32>
    %10 = vector.extract_strided_slice %6 {offsets = [0, 0, 0], sizes = [2, 1, 128], strides = [1, 1, 1]} : vector<2x8x128xf32> to vector<2x1x128xf32>
    %11 = vector.shape_cast %10 : vector<2x1x128xf32> to vector<2x128xf32>
    %c0_8 = arith.constant 0 : index
    %c0_9 = arith.constant 0 : index
    %12 = vector.load %arg3[%c0_8, %c0_9] : memref<32x128xf32, #tpu.memory_space<vmem>>, vector<32x128xf32>
    %cst_10 = arith.constant dense<0.000000e+00> : vector<2x128xf32>
    %13 = tpu.matmul %7, %12, %cst_10 {dimension_numbers = #tpu.dot_dimension_numbers<[1], [0], [0], [1], [0, 0, 1, 1], [], []>} : vector<2x32xf32>, vector<32x128xf32>, vector<2x128xf32> -> vector<2x128xf32>
    %14 = arith.addf %11, %13 : vector<2x128xf32>
    %15 = vector.extract_strided_slice %14 {offsets = [0, 0], sizes = [2, 32], strides = [1, 1]} : vector<2x128xf32> to vector<2x32xf32>
    %16 = arith.negf %15 : vector<2x32xf32>
    %17 = math.exp %16 : vector<2x32xf32>
    %cst_11 = arith.constant 1.000000e+00 : f32
    %18 = vector.broadcast %cst_11 : f32 to vector<2x32xf32>
    %19 = arith.addf %18, %17 : vector<2x32xf32>
    %20 = arith.divf %18, %19 : vector<2x32xf32>
    %21 = vector.extract_strided_slice %14 {offsets = [0, 32], sizes = [2, 32], strides = [1, 1]} : vector<2x128xf32> to vector<2x32xf32>
    %22 = arith.negf %21 : vector<2x32xf32>
    %23 = math.exp %22 : vector<2x32xf32>
    %cst_12 = arith.constant 1.000000e+00 : f32
    %24 = vector.broadcast %cst_12 : f32 to vector<2x32xf32>
    %25 = arith.addf %24, %23 : vector<2x32xf32>
    %26 = arith.divf %24, %25 : vector<2x32xf32>
    %27 = vector.extract_strided_slice %14 {offsets = [0, 64], sizes = [2, 32], strides = [1, 1]} : vector<2x128xf32> to vector<2x32xf32>
    %28 = math.tanh %27 : vector<2x32xf32>
    %29 = vector.extract_strided_slice %14 {offsets = [0, 96], sizes = [2, 32], strides = [1, 1]} : vector<2x128xf32> to vector<2x32xf32>
    %30 = arith.negf %29 : vector<2x32xf32>
    %31 = math.exp %30 : vector<2x32xf32>
    %cst_13 = arith.constant 1.000000e+00 : f32
    %32 = vector.broadcast %cst_13 : f32 to vector<2x32xf32>
    %33 = arith.addf %32, %31 : vector<2x32xf32>
    %34 = arith.divf %32, %33 : vector<2x32xf32>
    %35 = arith.mulf %26, %8 : vector<2x32xf32>
    %36 = arith.mulf %20, %28 : vector<2x32xf32>
    %37 = arith.addf %35, %36 : vector<2x32xf32>
    %38 = math.tanh %37 : vector<2x32xf32>
    %39 = arith.mulf %34, %38 : vector<2x32xf32>
    tpu.wait_dma2 semaphore(%arg9 : memref<!tpu.dma_semaphore, #tpu.memory_space<semaphore_mem>>) src(%arg6 : memref<256x128xf32, #tpu.memory_space<any>>) dst(%arg8 : memref<256x128xf32, #tpu.memory_space<vmem>>)
    %c0_14 = arith.constant 0 : index
    %c0_15 = arith.constant 0 : index
    %40 = vector.load %arg8[%c0_14, %c0_15] : memref<256x128xf32, #tpu.memory_space<vmem>>, vector<32x128xf32>
    %cst_16 = arith.constant dense<0.000000e+00> : vector<2x128xf32>
    %41 = tpu.matmul %39, %40, %cst_16 {dimension_numbers = #tpu.dot_dimension_numbers<[1], [0], [0], [1], [0, 0, 1, 1], [], []>} : vector<2x32xf32>, vector<32x128xf32>, vector<2x128xf32> -> vector<2x128xf32>
    %42 = arith.addf %9, %41 : vector<2x128xf32>
    %43 = vector.extract_strided_slice %6 {offsets = [0, 1, 0], sizes = [2, 1, 128], strides = [1, 1, 1]} : vector<2x8x128xf32> to vector<2x1x128xf32>
    %44 = vector.shape_cast %43 : vector<2x1x128xf32> to vector<2x128xf32>
    %c0_17 = arith.constant 0 : index
    %c0_18 = arith.constant 0 : index
    %45 = vector.load %arg3[%c0_17, %c0_18] : memref<32x128xf32, #tpu.memory_space<vmem>>, vector<32x128xf32>
    %cst_19 = arith.constant dense<0.000000e+00> : vector<2x128xf32>
    %46 = tpu.matmul %39, %45, %cst_19 {dimension_numbers = #tpu.dot_dimension_numbers<[1], [0], [0], [1], [0, 0, 1, 1], [], []>} : vector<2x32xf32>, vector<32x128xf32>, vector<2x128xf32> -> vector<2x128xf32>
    %47 = arith.addf %44, %46 : vector<2x128xf32>
    %48 = vector.extract_strided_slice %47 {offsets = [0, 0], sizes = [2, 32], strides = [1, 1]} : vector<2x128xf32> to vector<2x32xf32>
    %49 = arith.negf %48 : vector<2x32xf32>
    %50 = math.exp %49 : vector<2x32xf32>
    %cst_20 = arith.constant 1.000000e+00 : f32
    %51 = vector.broadcast %cst_20 : f32 to vector<2x32xf32>
    %52 = arith.addf %51, %50 : vector<2x32xf32>
    %53 = arith.divf %51, %52 : vector<2x32xf32>
    %54 = vector.extract_strided_slice %47 {offsets = [0, 32], sizes = [2, 32], strides = [1, 1]} : vector<2x128xf32> to vector<2x32xf32>
    %55 = arith.negf %54 : vector<2x32xf32>
    %56 = math.exp %55 : vector<2x32xf32>
    %cst_21 = arith.constant 1.000000e+00 : f32
    %57 = vector.broadcast %cst_21 : f32 to vector<2x32xf32>
    %58 = arith.addf %57, %56 : vector<2x32xf32>
    %59 = arith.divf %57, %58 : vector<2x32xf32>
    %60 = vector.extract_strided_slice %47 {offsets = [0, 64], sizes = [2, 32], strides = [1, 1]} : vector<2x128xf32> to vector<2x32xf32>
    %61 = math.tanh %60 : vector<2x32xf32>
    %62 = vector.extract_strided_slice %47 {offsets = [0, 96], sizes = [2, 32], strides = [1, 1]} : vector<2x128xf32> to vector<2x32xf32>
    %63 = arith.negf %62 : vector<2x32xf32>
    %64 = math.exp %63 : vector<2x32xf32>
    %cst_22 = arith.constant 1.000000e+00 : f32
    %65 = vector.broadcast %cst_22 : f32 to vector<2x32xf32>
    %66 = arith.addf %65, %64 : vector<2x32xf32>
    %67 = arith.divf %65, %66 : vector<2x32xf32>
    %68 = arith.mulf %59, %37 : vector<2x32xf32>
    %69 = arith.mulf %53, %61 : vector<2x32xf32>
    %70 = arith.addf %68, %69 : vector<2x32xf32>
    %71 = math.tanh %70 : vector<2x32xf32>
    %72 = arith.mulf %67, %71 : vector<2x32xf32>
    %c32 = arith.constant 32 : index
    %c0_23 = arith.constant 0 : index
    %73 = vector.load %arg8[%c32, %c0_23] : memref<256x128xf32, #tpu.memory_space<vmem>>, vector<32x128xf32>
    %cst_24 = arith.constant dense<0.000000e+00> : vector<2x128xf32>
    %74 = tpu.matmul %72, %73, %cst_24 {dimension_numbers = #tpu.dot_dimension_numbers<[1], [0], [0], [1], [0, 0, 1, 1], [], []>} : vector<2x32xf32>, vector<32x128xf32>, vector<2x128xf32> -> vector<2x128xf32>
    %75 = arith.addf %42, %74 : vector<2x128xf32>
    %76 = vector.extract_strided_slice %6 {offsets = [0, 2, 0], sizes = [2, 1, 128], strides = [1, 1, 1]} : vector<2x8x128xf32> to vector<2x1x128xf32>
    %77 = vector.shape_cast %76 : vector<2x1x128xf32> to vector<2x128xf32>
    %c0_25 = arith.constant 0 : index
    %c0_26 = arith.constant 0 : index
    %78 = vector.load %arg3[%c0_25, %c0_26] : memref<32x128xf32, #tpu.memory_space<vmem>>, vector<32x128xf32>
    %cst_27 = arith.constant dense<0.000000e+00> : vector<2x128xf32>
    %79 = tpu.matmul %72, %78, %cst_27 {dimension_numbers = #tpu.dot_dimension_numbers<[1], [0], [0], [1], [0, 0, 1, 1], [], []>} : vector<2x32xf32>, vector<32x128xf32>, vector<2x128xf32> -> vector<2x128xf32>
    %80 = arith.addf %77, %79 : vector<2x128xf32>
    %81 = vector.extract_strided_slice %80 {offsets = [0, 0], sizes = [2, 32], strides = [1, 1]} : vector<2x128xf32> to vector<2x32xf32>
    %82 = arith.negf %81 : vector<2x32xf32>
    %83 = math.exp %82 : vector<2x32xf32>
    %cst_28 = arith.constant 1.000000e+00 : f32
    %84 = vector.broadcast %cst_28 : f32 to vector<2x32xf32>
    %85 = arith.addf %84, %83 : vector<2x32xf32>
    %86 = arith.divf %84, %85 : vector<2x32xf32>
    %87 = vector.extract_strided_slice %80 {offsets = [0, 32], sizes = [2, 32], strides = [1, 1]} : vector<2x128xf32> to vector<2x32xf32>
    %88 = arith.negf %87 : vector<2x32xf32>
    %89 = math.exp %88 : vector<2x32xf32>
    %cst_29 = arith.constant 1.000000e+00 : f32
    %90 = vector.broadcast %cst_29 : f32 to vector<2x32xf32>
    %91 = arith.addf %90, %89 : vector<2x32xf32>
    %92 = arith.divf %90, %91 : vector<2x32xf32>
    %93 = vector.extract_strided_slice %80 {offsets = [0, 64], sizes = [2, 32], strides = [1, 1]} : vector<2x128xf32> to vector<2x32xf32>
    %94 = math.tanh %93 : vector<2x32xf32>
    %95 = vector.extract_strided_slice %80 {offsets = [0, 96], sizes = [2, 32], strides = [1, 1]} : vector<2x128xf32> to vector<2x32xf32>
    %96 = arith.negf %95 : vector<2x32xf32>
    %97 = math.exp %96 : vector<2x32xf32>
    %cst_30 = arith.constant 1.000000e+00 : f32
    %98 = vector.broadcast %cst_30 : f32 to vector<2x32xf32>
    %99 = arith.addf %98, %97 : vector<2x32xf32>
    %100 = arith.divf %98, %99 : vector<2x32xf32>
    %101 = arith.mulf %92, %70 : vector<2x32xf32>
    %102 = arith.mulf %86, %94 : vector<2x32xf32>
    %103 = arith.addf %101, %102 : vector<2x32xf32>
    %104 = math.tanh %103 : vector<2x32xf32>
    %105 = arith.mulf %100, %104 : vector<2x32xf32>
    %c64 = arith.constant 64 : index
    %c0_31 = arith.constant 0 : index
    %106 = vector.load %arg8[%c64, %c0_31] : memref<256x128xf32, #tpu.memory_space<vmem>>, vector<32x128xf32>
    %cst_32 = arith.constant dense<0.000000e+00> : vector<2x128xf32>
    %107 = tpu.matmul %105, %106, %cst_32 {dimension_numbers = #tpu.dot_dimension_numbers<[1], [0], [0], [1], [0, 0, 1, 1], [], []>} : vector<2x32xf32>, vector<32x128xf32>, vector<2x128xf32> -> vector<2x128xf32>
    %108 = arith.addf %75, %107 : vector<2x128xf32>
    %109 = vector.extract_strided_slice %6 {offsets = [0, 3, 0], sizes = [2, 1, 128], strides = [1, 1, 1]} : vector<2x8x128xf32> to vector<2x1x128xf32>
    %110 = vector.shape_cast %109 : vector<2x1x128xf32> to vector<2x128xf32>
    %c0_33 = arith.constant 0 : index
    %c0_34 = arith.constant 0 : index
    %111 = vector.load %arg3[%c0_33, %c0_34] : memref<32x128xf32, #tpu.memory_space<vmem>>, vector<32x128xf32>
    %cst_35 = arith.constant dense<0.000000e+00> : vector<2x128xf32>
    %112 = tpu.matmul %105, %111, %cst_35 {dimension_numbers = #tpu.dot_dimension_numbers<[1], [0], [0], [1], [0, 0, 1, 1], [], []>} : vector<2x32xf32>, vector<32x128xf32>, vector<2x128xf32> -> vector<2x128xf32>
    %113 = arith.addf %110, %112 : vector<2x128xf32>
    %114 = vector.extract_strided_slice %113 {offsets = [0, 0], sizes = [2, 32], strides = [1, 1]} : vector<2x128xf32> to vector<2x32xf32>
    %115 = arith.negf %114 : vector<2x32xf32>
    %116 = math.exp %115 : vector<2x32xf32>
    %cst_36 = arith.constant 1.000000e+00 : f32
    %117 = vector.broadcast %cst_36 : f32 to vector<2x32xf32>
    %118 = arith.addf %117, %116 : vector<2x32xf32>
    %119 = arith.divf %117, %118 : vector<2x32xf32>
    %120 = vector.extract_strided_slice %113 {offsets = [0, 32], sizes = [2, 32], strides = [1, 1]} : vector<2x128xf32> to vector<2x32xf32>
    %121 = arith.negf %120 : vector<2x32xf32>
    %122 = math.exp %121 : vector<2x32xf32>
    %cst_37 = arith.constant 1.000000e+00 : f32
    %123 = vector.broadcast %cst_37 : f32 to vector<2x32xf32>
    %124 = arith.addf %123, %122 : vector<2x32xf32>
    %125 = arith.divf %123, %124 : vector<2x32xf32>
    %126 = vector.extract_strided_slice %113 {offsets = [0, 64], sizes = [2, 32], strides = [1, 1]} : vector<2x128xf32> to vector<2x32xf32>
    %127 = math.tanh %126 : vector<2x32xf32>
    %128 = vector.extract_strided_slice %113 {offsets = [0, 96], sizes = [2, 32], strides = [1, 1]} : vector<2x128xf32> to vector<2x32xf32>
    %129 = arith.negf %128 : vector<2x32xf32>
    %130 = math.exp %129 : vector<2x32xf32>
    %cst_38 = arith.constant 1.000000e+00 : f32
    %131 = vector.broadcast %cst_38 : f32 to vector<2x32xf32>
    %132 = arith.addf %131, %130 : vector<2x32xf32>
    %133 = arith.divf %131, %132 : vector<2x32xf32>
    %134 = arith.mulf %125, %103 : vector<2x32xf32>
    %135 = arith.mulf %119, %127 : vector<2x32xf32>
    %136 = arith.addf %134, %135 : vector<2x32xf32>
    %137 = math.tanh %136 : vector<2x32xf32>
    %138 = arith.mulf %133, %137 : vector<2x32xf32>
    %c96 = arith.constant 96 : index
    %c0_39 = arith.constant 0 : index
    %139 = vector.load %arg8[%c96, %c0_39] : memref<256x128xf32, #tpu.memory_space<vmem>>, vector<32x128xf32>
    %cst_40 = arith.constant dense<0.000000e+00> : vector<2x128xf32>
    %140 = tpu.matmul %138, %139, %cst_40 {dimension_numbers = #tpu.dot_dimension_numbers<[1], [0], [0], [1], [0, 0, 1, 1], [], []>} : vector<2x32xf32>, vector<32x128xf32>, vector<2x128xf32> -> vector<2x128xf32>
    %141 = arith.addf %108, %140 : vector<2x128xf32>
    %142 = vector.extract_strided_slice %6 {offsets = [0, 4, 0], sizes = [2, 1, 128], strides = [1, 1, 1]} : vector<2x8x128xf32> to vector<2x1x128xf32>
    %143 = vector.shape_cast %142 : vector<2x1x128xf32> to vector<2x128xf32>
    %c0_41 = arith.constant 0 : index
    %c0_42 = arith.constant 0 : index
    %144 = vector.load %arg3[%c0_41, %c0_42] : memref<32x128xf32, #tpu.memory_space<vmem>>, vector<32x128xf32>
    %cst_43 = arith.constant dense<0.000000e+00> : vector<2x128xf32>
    %145 = tpu.matmul %138, %144, %cst_43 {dimension_numbers = #tpu.dot_dimension_numbers<[1], [0], [0], [1], [0, 0, 1, 1], [], []>} : vector<2x32xf32>, vector<32x128xf32>, vector<2x128xf32> -> vector<2x128xf32>
    %146 = arith.addf %143, %145 : vector<2x128xf32>
    %147 = vector.extract_strided_slice %146 {offsets = [0, 0], sizes = [2, 32], strides = [1, 1]} : vector<2x128xf32> to vector<2x32xf32>
    %148 = arith.negf %147 : vector<2x32xf32>
    %149 = math.exp %148 : vector<2x32xf32>
    %cst_44 = arith.constant 1.000000e+00 : f32
    %150 = vector.broadcast %cst_44 : f32 to vector<2x32xf32>
    %151 = arith.addf %150, %149 : vector<2x32xf32>
    %152 = arith.divf %150, %151 : vector<2x32xf32>
    %153 = vector.extract_strided_slice %146 {offsets = [0, 32], sizes = [2, 32], strides = [1, 1]} : vector<2x128xf32> to vector<2x32xf32>
    %154 = arith.negf %153 : vector<2x32xf32>
    %155 = math.exp %154 : vector<2x32xf32>
    %cst_45 = arith.constant 1.000000e+00 : f32
    %156 = vector.broadcast %cst_45 : f32 to vector<2x32xf32>
    %157 = arith.addf %156, %155 : vector<2x32xf32>
    %158 = arith.divf %156, %157 : vector<2x32xf32>
    %159 = vector.extract_strided_slice %146 {offsets = [0, 64], sizes = [2, 32], strides = [1, 1]} : vector<2x128xf32> to vector<2x32xf32>
    %160 = math.tanh %159 : vector<2x32xf32>
    %161 = vector.extract_strided_slice %146 {offsets = [0, 96], sizes = [2, 32], strides = [1, 1]} : vector<2x128xf32> to vector<2x32xf32>
    %162 = arith.negf %161 : vector<2x32xf32>
    %163 = math.exp %162 : vector<2x32xf32>
    %cst_46 = arith.constant 1.000000e+00 : f32
    %164 = vector.broadcast %cst_46 : f32 to vector<2x32xf32>
    %165 = arith.addf %164, %163 : vector<2x32xf32>
    %166 = arith.divf %164, %165 : vector<2x32xf32>
    %167 = arith.mulf %158, %136 : vector<2x32xf32>
    %168 = arith.mulf %152, %160 : vector<2x32xf32>
    %169 = arith.addf %167, %168 : vector<2x32xf32>
    %170 = math.tanh %169 : vector<2x32xf32>
    %171 = arith.mulf %166, %170 : vector<2x32xf32>
    %c128 = arith.constant 128 : index
    %c0_47 = arith.constant 0 : index
    %172 = vector.load %arg8[%c128, %c0_47] : memref<256x128xf32, #tpu.memory_space<vmem>>, vector<32x128xf32>
    %cst_48 = arith.constant dense<0.000000e+00> : vector<2x128xf32>
    %173 = tpu.matmul %171, %172, %cst_48 {dimension_numbers = #tpu.dot_dimension_numbers<[1], [0], [0], [1], [0, 0, 1, 1], [], []>} : vector<2x32xf32>, vector<32x128xf32>, vector<2x128xf32> -> vector<2x128xf32>
    %174 = arith.addf %141, %173 : vector<2x128xf32>
    %175 = vector.extract_strided_slice %6 {offsets = [0, 5, 0], sizes = [2, 1, 128], strides = [1, 1, 1]} : vector<2x8x128xf32> to vector<2x1x128xf32>
    %176 = vector.shape_cast %175 : vector<2x1x128xf32> to vector<2x128xf32>
    %c0_49 = arith.constant 0 : index
    %c0_50 = arith.constant 0 : index
    %177 = vector.load %arg3[%c0_49, %c0_50] : memref<32x128xf32, #tpu.memory_space<vmem>>, vector<32x128xf32>
    %cst_51 = arith.constant dense<0.000000e+00> : vector<2x128xf32>
    %178 = tpu.matmul %171, %177, %cst_51 {dimension_numbers = #tpu.dot_dimension_numbers<[1], [0], [0], [1], [0, 0, 1, 1], [], []>} : vector<2x32xf32>, vector<32x128xf32>, vector<2x128xf32> -> vector<2x128xf32>
    %179 = arith.addf %176, %178 : vector<2x128xf32>
    %180 = vector.extract_strided_slice %179 {offsets = [0, 0], sizes = [2, 32], strides = [1, 1]} : vector<2x128xf32> to vector<2x32xf32>
    %181 = arith.negf %180 : vector<2x32xf32>
    %182 = math.exp %181 : vector<2x32xf32>
    %cst_52 = arith.constant 1.000000e+00 : f32
    %183 = vector.broadcast %cst_52 : f32 to vector<2x32xf32>
    %184 = arith.addf %183, %182 : vector<2x32xf32>
    %185 = arith.divf %183, %184 : vector<2x32xf32>
    %186 = vector.extract_strided_slice %179 {offsets = [0, 32], sizes = [2, 32], strides = [1, 1]} : vector<2x128xf32> to vector<2x32xf32>
    %187 = arith.negf %186 : vector<2x32xf32>
    %188 = math.exp %187 : vector<2x32xf32>
    %cst_53 = arith.constant 1.000000e+00 : f32
    %189 = vector.broadcast %cst_53 : f32 to vector<2x32xf32>
    %190 = arith.addf %189, %188 : vector<2x32xf32>
    %191 = arith.divf %189, %190 : vector<2x32xf32>
    %192 = vector.extract_strided_slice %179 {offsets = [0, 64], sizes = [2, 32], strides = [1, 1]} : vector<2x128xf32> to vector<2x32xf32>
    %193 = math.tanh %192 : vector<2x32xf32>
    %194 = vector.extract_strided_slice %179 {offsets = [0, 96], sizes = [2, 32], strides = [1, 1]} : vector<2x128xf32> to vector<2x32xf32>
    %195 = arith.negf %194 : vector<2x32xf32>
    %196 = math.exp %195 : vector<2x32xf32>
    %cst_54 = arith.constant 1.000000e+00 : f32
    %197 = vector.broadcast %cst_54 : f32 to vector<2x32xf32>
    %198 = arith.addf %197, %196 : vector<2x32xf32>
    %199 = arith.divf %197, %198 : vector<2x32xf32>
    %200 = arith.mulf %191, %169 : vector<2x32xf32>
    %201 = arith.mulf %185, %193 : vector<2x32xf32>
    %202 = arith.addf %200, %201 : vector<2x32xf32>
    %203 = math.tanh %202 : vector<2x32xf32>
    %204 = arith.mulf %199, %203 : vector<2x32xf32>
    %c160 = arith.constant 160 : index
    %c0_55 = arith.constant 0 : index
    %205 = vector.load %arg8[%c160, %c0_55] : memref<256x128xf32, #tpu.memory_space<vmem>>, vector<32x128xf32>
    %cst_56 = arith.constant dense<0.000000e+00> : vector<2x128xf32>
    %206 = tpu.matmul %204, %205, %cst_56 {dimension_numbers = #tpu.dot_dimension_numbers<[1], [0], [0], [1], [0, 0, 1, 1], [], []>} : vector<2x32xf32>, vector<32x128xf32>, vector<2x128xf32> -> vector<2x128xf32>
    %207 = arith.addf %174, %206 : vector<2x128xf32>
    %208 = vector.extract_strided_slice %6 {offsets = [0, 6, 0], sizes = [2, 1, 128], strides = [1, 1, 1]} : vector<2x8x128xf32> to vector<2x1x128xf32>
    %209 = vector.shape_cast %208 : vector<2x1x128xf32> to vector<2x128xf32>
    %c0_57 = arith.constant 0 : index
    %c0_58 = arith.constant 0 : index
    %210 = vector.load %arg3[%c0_57, %c0_58] : memref<32x128xf32, #tpu.memory_space<vmem>>, vector<32x128xf32>
    %cst_59 = arith.constant dense<0.000000e+00> : vector<2x128xf32>
    %211 = tpu.matmul %204, %210, %cst_59 {dimension_numbers = #tpu.dot_dimension_numbers<[1], [0], [0], [1], [0, 0, 1, 1], [], []>} : vector<2x32xf32>, vector<32x128xf32>, vector<2x128xf32> -> vector<2x128xf32>
    %212 = arith.addf %209, %211 : vector<2x128xf32>
    %213 = vector.extract_strided_slice %212 {offsets = [0, 0], sizes = [2, 32], strides = [1, 1]} : vector<2x128xf32> to vector<2x32xf32>
    %214 = arith.negf %213 : vector<2x32xf32>
    %215 = math.exp %214 : vector<2x32xf32>
    %cst_60 = arith.constant 1.000000e+00 : f32
    %216 = vector.broadcast %cst_60 : f32 to vector<2x32xf32>
    %217 = arith.addf %216, %215 : vector<2x32xf32>
    %218 = arith.divf %216, %217 : vector<2x32xf32>
    %219 = vector.extract_strided_slice %212 {offsets = [0, 32], sizes = [2, 32], strides = [1, 1]} : vector<2x128xf32> to vector<2x32xf32>
    %220 = arith.negf %219 : vector<2x32xf32>
    %221 = math.exp %220 : vector<2x32xf32>
    %cst_61 = arith.constant 1.000000e+00 : f32
    %222 = vector.broadcast %cst_61 : f32 to vector<2x32xf32>
    %223 = arith.addf %222, %221 : vector<2x32xf32>
    %224 = arith.divf %222, %223 : vector<2x32xf32>
    %225 = vector.extract_strided_slice %212 {offsets = [0, 64], sizes = [2, 32], strides = [1, 1]} : vector<2x128xf32> to vector<2x32xf32>
    %226 = math.tanh %225 : vector<2x32xf32>
    %227 = vector.extract_strided_slice %212 {offsets = [0, 96], sizes = [2, 32], strides = [1, 1]} : vector<2x128xf32> to vector<2x32xf32>
    %228 = arith.negf %227 : vector<2x32xf32>
    %229 = math.exp %228 : vector<2x32xf32>
    %cst_62 = arith.constant 1.000000e+00 : f32
    %230 = vector.broadcast %cst_62 : f32 to vector<2x32xf32>
    %231 = arith.addf %230, %229 : vector<2x32xf32>
    %232 = arith.divf %230, %231 : vector<2x32xf32>
    %233 = arith.mulf %224, %202 : vector<2x32xf32>
    %234 = arith.mulf %218, %226 : vector<2x32xf32>
    %235 = arith.addf %233, %234 : vector<2x32xf32>
    %236 = math.tanh %235 : vector<2x32xf32>
    %237 = arith.mulf %232, %236 : vector<2x32xf32>
    %c192 = arith.constant 192 : index
    %c0_63 = arith.constant 0 : index
    %238 = vector.load %arg8[%c192, %c0_63] : memref<256x128xf32, #tpu.memory_space<vmem>>, vector<32x128xf32>
    %cst_64 = arith.constant dense<0.000000e+00> : vector<2x128xf32>
    %239 = tpu.matmul %237, %238, %cst_64 {dimension_numbers = #tpu.dot_dimension_numbers<[1], [0], [0], [1], [0, 0, 1, 1], [], []>} : vector<2x32xf32>, vector<32x128xf32>, vector<2x128xf32> -> vector<2x128xf32>
    %240 = arith.addf %207, %239 : vector<2x128xf32>
    %241 = vector.extract_strided_slice %6 {offsets = [0, 7, 0], sizes = [2, 1, 128], strides = [1, 1, 1]} : vector<2x8x128xf32> to vector<2x1x128xf32>
    %242 = vector.shape_cast %241 : vector<2x1x128xf32> to vector<2x128xf32>
    %c0_65 = arith.constant 0 : index
    %c0_66 = arith.constant 0 : index
    %243 = vector.load %arg3[%c0_65, %c0_66] : memref<32x128xf32, #tpu.memory_space<vmem>>, vector<32x128xf32>
    %cst_67 = arith.constant dense<0.000000e+00> : vector<2x128xf32>
    %244 = tpu.matmul %237, %243, %cst_67 {dimension_numbers = #tpu.dot_dimension_numbers<[1], [0], [0], [1], [0, 0, 1, 1], [], []>} : vector<2x32xf32>, vector<32x128xf32>, vector<2x128xf32> -> vector<2x128xf32>
    %245 = arith.addf %242, %244 : vector<2x128xf32>
    %246 = vector.extract_strided_slice %245 {offsets = [0, 0], sizes = [2, 32], strides = [1, 1]} : vector<2x128xf32> to vector<2x32xf32>
    %247 = arith.negf %246 : vector<2x32xf32>
    %248 = math.exp %247 : vector<2x32xf32>
    %cst_68 = arith.constant 1.000000e+00 : f32
    %249 = vector.broadcast %cst_68 : f32 to vector<2x32xf32>
    %250 = arith.addf %249, %248 : vector<2x32xf32>
    %251 = arith.divf %249, %250 : vector<2x32xf32>
    %252 = vector.extract_strided_slice %245 {offsets = [0, 32], sizes = [2, 32], strides = [1, 1]} : vector<2x128xf32> to vector<2x32xf32>
    %253 = arith.negf %252 : vector<2x32xf32>
    %254 = math.exp %253 : vector<2x32xf32>
    %cst_69 = arith.constant 1.000000e+00 : f32
    %255 = vector.broadcast %cst_69 : f32 to vector<2x32xf32>
    %256 = arith.addf %255, %254 : vector<2x32xf32>
    %257 = arith.divf %255, %256 : vector<2x32xf32>
    %258 = vector.extract_strided_slice %245 {offsets = [0, 64], sizes = [2, 32], strides = [1, 1]} : vector<2x128xf32> to vector<2x32xf32>
    %259 = math.tanh %258 : vector<2x32xf32>
    %260 = vector.extract_strided_slice %245 {offsets = [0, 96], sizes = [2, 32], strides = [1, 1]} : vector<2x128xf32> to vector<2x32xf32>
    %261 = arith.negf %260 : vector<2x32xf32>
    %262 = math.exp %261 : vector<2x32xf32>
    %cst_70 = arith.constant 1.000000e+00 : f32
    %263 = vector.broadcast %cst_70 : f32 to vector<2x32xf32>
    %264 = arith.addf %263, %262 : vector<2x32xf32>
    %265 = arith.divf %263, %264 : vector<2x32xf32>
    %266 = arith.mulf %257, %235 : vector<2x32xf32>
    %267 = arith.mulf %251, %259 : vector<2x32xf32>
    %268 = arith.addf %266, %267 : vector<2x32xf32>
    %269 = math.tanh %268 : vector<2x32xf32>
    %270 = arith.mulf %265, %269 : vector<2x32xf32>
    %c224 = arith.constant 224 : index
    %c0_71 = arith.constant 0 : index
    %271 = vector.load %arg8[%c224, %c0_71] : memref<256x128xf32, #tpu.memory_space<vmem>>, vector<32x128xf32>
    %cst_72 = arith.constant dense<0.000000e+00> : vector<2x128xf32>
    %272 = tpu.matmul %270, %271, %cst_72 {dimension_numbers = #tpu.dot_dimension_numbers<[1], [0], [0], [1], [0, 0, 1, 1], [], []>} : vector<2x32xf32>, vector<32x128xf32>, vector<2x128xf32> -> vector<2x128xf32>
    %273 = arith.addf %240, %272 : vector<2x128xf32>
    %c0_73 = arith.constant 0 : index
    %c0_74 = arith.constant 0 : index
    %274 = vector.load %arg5[%c0_73, %c0_74] : memref<1x128xf32, #tpu.memory_space<vmem>>, vector<1x128xf32>
    %275 = vector.broadcast %274 : vector<1x128xf32> to vector<2x128xf32>
    %276 = arith.addf %273, %275 : vector<2x128xf32>
    %c0_75 = arith.constant 0 : index
    %c0_76 = arith.constant 0 : index
    %277 = vector.load %arg7[%c0_75, %c0_76] : memref<2x128xf32, #tpu.memory_space<vmem>>, vector<2x128xf32>
    tpu.vector_store %arg7[%c0_75, %c0_76], %276 {strides = array<i32>} : memref<2x128xf32, #tpu.memory_space<vmem>>, vector<2x128xf32>,
    return
  }
  func.func @transform_0(%arg0: i32) -> (i32, i32) {
    %c0_i32 = arith.constant 0 : i32
    %c0_i32_0 = arith.constant 0 : i32
    %c0_i32_1 = arith.constant 0 : i32
    return %c0_i32, %c0_i32_0 : i32, i32
  }
  func.func @transform_1(%arg0: i32) -> (i32, i32) {
    %c0_i32 = arith.constant 0 : i32
    %c0_i32_0 = arith.constant 0 : i32
    %c0_i32_1 = arith.constant 0 : i32
    return %c0_i32, %c0_i32_0 : i32, i32
  }
  func.func @transform_2(%arg0: i32) -> (i32, i32) {
    %c0_i32 = arith.constant 0 : i32
    %c0_i32_0 = arith.constant 0 : i32
    %c0_i32_1 = arith.constant 0 : i32
    return %c0_i32, %c0_i32_0 : i32, i32
  }
  func.func @transform_3(%arg0: i32) -> (i32, i32) {
    %c0_i32 = arith.constant 0 : i32
    %c0_i32_0 = arith.constant 0 : i32
    %c0_i32_1 = arith.constant 0 : i32
    return %c0_i32, %c0_i32_0 : i32, i32
  }
  func.func @transform_4(%arg0: i32) -> (i32, i32) {
    %c0_i32 = arith.constant 0 : i32
    %c0_i32_0 = arith.constant 0 : i32
    %c0_i32_1 = arith.constant 0 : i32
    return %c0_i32, %c0_i32_0 : i32, i32
  }
  func.func @transform_6(%arg0: i32) -> (i32, i32) {
    %c0_i32 = arith.constant 0 : i32
    %c0_i32_0 = arith.constant 0 : i32
    %c0_i32_1 = arith.constant 0 : i32
    return %c0_i32, %c0_i32_0 : i32, i32
  }
}

</mosaic_0001>

<bundles_post_ra>
// kernel: tpu_custom_call.1
= control target key start
LH: loop header
LB: loop body
LE: loop exit
PB: predicated region body
PF: predicated region fallthrough
CT: control target
= control target key end

     0   :  { %11 = vsyncpa [#allocation5], 0  ;;  %s2973_s0 = inlined_call_operand.hbm [shape: f32[16,16], index: 0, kind: input, shape index: {}]   ;;  %s2974_s1 = inlined_call_operand.hbm [shape: f32[16,128], index: 1, kind: input, shape index: {}]   ;;  %s2975_s2 = inlined_call_operand.hbm [shape: f32[32,128], index: 2, kind: input, shape index: {}]   ;;  %s2976_s3 = inlined_call_operand.vmem [shape: f32[1,128], index: 3, kind: input, shape index: {}]   ;;  %s2977_s4 = inlined_call_operand.vmem [shape: f32[1,128], index: 4, kind: input, shape index: {}]   ;;  %s2978_s5 = inlined_call_operand.hbm [shape: f32[256,128], index: 5, kind: input, shape index: {}]   ;;  %s2979_s6 = inlined_call_operand.hbm [shape: f32[2,128], index: 6, kind: output, shape index: {}]  }
   0x1   :  { %12 = vsyncpa [#allocation8], 0 }
   0x2   :  { %13 = vsyncpa [#allocation6], 0  ;;  %s2583_s21 = smov [#allocation7]   ;;  %s2584_s23 = smov [#allocation4]  }
   0x3   :  { %s31_s22 = sshll.u32 %s2583_s21, 4  ;;  %s19_s24 = sshll.u32 %s2584_s23, 4  ;;  %s32_s22 = int_to_ptr.vmem [resolvable:$true] %s31_s22  ;;  %s2630_s24 = int_to_ptr.vmem [resolvable:$true] %s19_s24 }
   0x4   :  { %s2465_s27 = scalar_lea.hbm %s2974_s1, 256 }
   0x5   :  { %p2466_p0 = scmp.ne.s32.totalorder %s2974_s1, %s2465_s27  ;;  %p2469_p1 = scmp.lt.u32.totalorder %s2465_s27, %s2974_s1 }
   0x7   :  { %p2471_p2 = pnand %p2469_p1, %p2466_p0 }
   0x9   :  { %2474 = shalt.err (!%p2471_p2)
}
   0xa   :  { %s2475_s8 = scalar_lea.vmem %s32_s22, 256  ;;  %p2480_p4 = scmp.lt.s32.totalorder %s32_s22, %s32_s22 }
   0xb   :  { %p2476_p3 = scmp.ne.s32.totalorder %s32_s22, %s2475_s8  ;;  %p2481_p5 = scmp.lt.s32.totalorder %s2475_s8, %s2475_s8 }
   0xd   :  { %p2482_p6 = por %p2481_p5, %p2480_p4 }
   0xf   :  { %p2483_p7 = pnand %p2482_p6, %p2476_p3 }
  0x11   :  { %2486 = shalt.err (!%p2483_p7)
}
  0x12   :  { %s2585_s9 = smov 128   ;;  %s2586_s10 = smov 8  }
  0x13   :  { %37 = dma.hbm_to_vmem [thread:$0]  %s2974_s1, 256, %s32_s22, [#allocation8], %s2585_s9, %s2585_s9, %s2586_s10  }
  0x14   :  { %s2487_s15 = scalar_lea.hbm %s2973_s0, 256 }
  0x15   :  { %p2488_p8 = scmp.ne.s32.totalorder %s2973_s0, %s2487_s15  ;;  %p2491_p9 = scmp.lt.u32.totalorder %s2487_s15, %s2973_s0 }
  0x17   :  { %p2493_p10 = pnand %p2491_p9, %p2488_p8 }
  0x19   :  { %2496 = shalt.err (!%p2493_p10)
}
  0x1a   :  { %s2497_s20 = scalar_lea.vmem %s2630_s24, 256  ;;  %p2502_p12 = scmp.lt.s32.totalorder %s2630_s24, %s2630_s24 }
  0x1b   :  { %p2498_p11 = scmp.ne.s32.totalorder %s2630_s24, %s2497_s20  ;;  %p2503_p13 = scmp.lt.s32.totalorder %s2497_s20, %s2497_s20 }
  0x1d   :  { %p2504_p0 = por %p2503_p13, %p2502_p12 }
  0x1f   :  { %p2505_p1 = pnand %p2504_p0, %p2498_p11 }
  0x21   :  { %2508 = shalt.err (!%p2505_p1)
}
  0x22   :  { %25 = dma.hbm_to_vmem [thread:$0]  %s2973_s0, 256, %s2630_s24, [#allocation5], %s2585_s9, %s2585_s9, %s2586_s10  }
  0x23   :  { %s2587_s22 = smov [#allocation9]   ;;  %s2509_s27 = scalar_lea.hbm %s2975_s2, 512 }
  0x24   :  { %s43_s23 = sshll.u32 %s2587_s22, 4  ;;  %p2510_p2 = scmp.ne.s32.totalorder %s2975_s2, %s2509_s27  ;;  %s44_s23 = int_to_ptr.vmem [resolvable:$true] %s43_s23 }
  0x25   :  { %p2513_p3 = scmp.lt.u32.totalorder %s2509_s27, %s2975_s2 }
  0x27   :  { %p2515_p4 = pnand %p2513_p3, %p2510_p2 }
  0x29   :  { %2518 = shalt.err (!%p2515_p4)
}
  0x2a   :  { %s2519_s8 = scalar_lea.vmem %s44_s23, 512  ;;  %p2524_p6 = scmp.lt.s32.totalorder %s44_s23, %s44_s23 }
  0x2b   :  { %p2520_p5 = scmp.ne.s32.totalorder %s44_s23, %s2519_s8  ;;  %p2525_p7 = scmp.lt.s32.totalorder %s2519_s8, %s2519_s8 }
  0x2d   :  { %p2526_p8 = por %p2525_p7, %p2524_p6 }
  0x2f   :  { %p2527_p9 = pnand %p2526_p8, %p2520_p5 }
  0x31   :  { %2530 = shalt.err (!%p2527_p9)
}
  0x32   :  { %49 = dma.hbm_to_vmem [thread:$0]  %s2975_s2, 512, %s44_s23, [#allocation8], %s2585_s9, %s2585_s9, %s2586_s10  }
  0x33   :  { %2575 = dma.done.wait [#allocation5], 256  }
  0x34   :  { %2576 = vsyncadd [#allocation5], 4294967040 }
  0x35   :  { %2577 = dma.done.wait [#allocation8], 768  }
  0x36   :  { %2578 = vsyncadd [#allocation8], 4294966528  ;;  %vm171_vm0 = vcmask 261120   ;;  %v2588_v0 = vmov 0.0|0.0   ;;  %vm2589_vm1 = vmmov 0   ;;  %v2590_v1 = vmov 0.0  }
  0x37   :  { %2229 = vmatprep.subr.bf16.mxu1 %v2588_v0  ;;  %2057 = vmatprep.mubr.msk.f32.mxu1 %vm2589_vm1, %v2590_v1  ;;  %vm85_vm2 = vcmask 130048   ;;  %v76_v2 = vld [vmem:[#allocation7] sm:$0xff]  ;;  %v77_v3 = vld [vmem:[#allocation7 + $0x8] sm:$0xff]  ;;  %v167_v4 = vld [vmem:[#allocation9] sm:$0xff]  ;;  %s2591_s10 = smov 64   ;;  %s2593_s11 = smov [#allocation2]  }
  0x38   :  { %v2225_v5 = vpack.c.bf16 %v77_v3, %v76_v2  ;;  %v168_v6 = vld [vmem:[#allocation9 + $0x8] sm:$0xff]  ;;  %v74_v7 = vld [vmem:[#allocation4] sm:$0xff]  ;;  %v169_v9 = vld [vmem:[#allocation9 + $0x10] sm:$0xff]  ;;  %s70_s12 = sshll.u32 %s2593_s11, 4  ;;  %s2531_s15 = scalar_lea.hbm %s2978_s5, 4096  ;;  %s71_s12 = int_to_ptr.vmem [resolvable:$true] %s70_s12 }
  0x39   :  { %v2230_v8 = vpack.c.bf16 %v168_v6, %v167_v4  ;;  %2046 = vmatprep.mubr.msk.f32.mxu0 %vm85_vm2, %v74_v7  ;;  %v170_v10 = vld [vmem:[#allocation9 + $0x18] sm:$0xff]  ;;  %v75_v11 = vld [vmem:[#allocation4 + $0x8] sm:$0xff]  ;;  %v1922_v13 = vld [vmem:[%s2976_s3] ss:$0 sm:$0xff]  ;;  %s2592_s3 = smov 32   ;;  %p2532_p10 = scmp.ne.s32.totalorder %s2978_s5, %s2531_s15 }
  0x3a   :  { %2226 = vmatprep.subr.bf16.mxu0 %v2225_v5  ;;  %v2233_v12 = vpack.c.bf16 %v170_v10, %v169_v9  ;;  %p2535_p11 = scmp.lt.u32.totalorder %s2531_s15, %s2978_s5 }
  0x3b   :  { %2231 = vmatpush3.bf16.msra.mxu1 %v2230_v8  ;;  %2228 = vmatpush3.bf16.msra.mxu0 %v2225_v5 }
  0x3c   :  { %2232 = vmatprep.subr.bf16.mxu1 %v2588_v0  ;;  %p2537_p12 = pnand %p2535_p11, %p2532_p10 }
  0x3e   :  { %2047 = vmatmul.mubr.msk.f32.vlgmr.msra.gmra.mrb[0].mxu0 %vm85_vm2, %v75_v11 }
  0x3f   :  { %2234 = vmatpush3.bf16.msra.mxu1 %v2233_v12 }
  0x42   :  { %2058 = vmatmul.mubr.f32.vlgmr.msra.gmra.mrb[0].mxu1 %v2590_v1 }
 0x111   :  { %v2048_v14 = vpop.f32.mrb[0].mxu0 }
 0x112   :  { %v158_v15 = vpop.f32.mrb[1].mxu0  ;;  %v2694_v18 = vadd.f32 %v2048_v14, %v1922_v13 }
 0x113   :  { %v2692_v16 = vadd.f32 %v1922_v13, %v158_v15 }
 0x115   :  { %v241_v17 = vpop.f32.mrb[0].mxu1 }
 0x116   :  { %v246_v19 = vrot.slane %v241_v17, 1  ;;  %v249_v20 = vadd.f32 %v241_v17, %v2692_v16  ;;  %v2059_v21 = vpop.f32.mrb[1].mxu1 }
 0x118   :  { %v250_v22 = vadd.f32 %v246_v19, %v2694_v18  ;;  %2337 = vtanh.f32 %v249_v20  ;;  %v1925_v25 = vmul.f32 -1.442695, %v249_v20 }
 0x11a   :  { %2339 = vtanh.f32 %v250_v22  ;;  %v1926_v26 = vmul.f32 -1.442695, %v250_v22 }
 0x11b   :  { %2341 = vpow2.f32 %v1925_v25 }
 0x11c   :  { %2343 = vpow2.f32 %v1926_v26 }
 0x122   :  { %v2338_v23 = vpop.eup %2337 }
 0x123   :  { %269 = vrot.lane.b32.xlu0 %v2338_v23, %s2591_s10 }
 0x124   :  { %v2340_v24 = vpop.eup %2339 }
 0x125   :  { %v2342_v27 = vpop.eup %2341 }
 0x126   :  { %v257_v28 = vadd.f32 1.0, %v2342_v27  ;;  %v2344_v29 = vpop.eup %2343 }
 0x127   :  { %271 = vrot.lane.b32.xlu0 %v2340_v24, %s2591_s10  ;;  %v258_v30 = vadd.f32 1.0, %v2344_v29 }
 0x128   :  { %2345 = vrcp.f32 %v257_v28 }
 0x129   :  { %2347 = vrcp.f32 %v258_v30 }
 0x132   :  { %v2346_v31 = vpop.eup %2345 }
 0x133   :  { %v2348_v34 = vpop.eup %2347  ;;  %v265_v37 = vmul.f32 0.0, %v2346_v31 }
 0x134   :  { %v266_v40 = vmul.f32 0.0, %v2348_v34 }
 0x195   :  { %v270_v32 = vpop.permute.xlu0 %269 }
 0x196   :  { %v275_v33 = vmul.f32 %v2346_v31, %v270_v32 }
 0x198   :  { %279 = vrot.lane.b32.xlu1 %v275_v33, %s2592_s3 }
 0x199   :  { %v272_v35 = vpop.permute.xlu0 %271 }
 0x19a   :  { %v276_v36 = vmul.f32 %v2348_v34, %v272_v35 }
 0x19c   :  { %281 = vrot.lane.b32.xlu1 %v276_v36, %s2592_s3 }
 0x20a   :  { %v280_v38 = vpop.permute.xlu1 %279 }
 0x20b   :  { %v2702_v39 = vadd.f32 %v280_v38, %v265_v37 }
 0x20d   :  { %2349 = vtanh.f32 %v2702_v39 }
 0x20e   :  { %v282_v41 = vpop.permute.xlu1 %281 }
 0x20f   :  { %v2705_v42 = vadd.f32 %v282_v41, %v266_v40 }
 0x210   :  { %2540 = shalt.err (!%p2537_p12)  }
 0x211   :  { %s2541_s20 = scalar_lea.vmem %s71_s12, 4096  ;;  %p2546_p0 = scmp.lt.s32.totalorder %s71_s12, %s71_s12 }
 0x212   :  { %p2542_p13 = scmp.ne.s32.totalorder %s71_s12, %s2541_s20  ;;  %p2547_p1 = scmp.lt.s32.totalorder %s2541_s20, %s2541_s20 }
 0x214   :  { %p2548_p2 = por %p2547_p1, %p2546_p0 }
 0x216   :  { %p2549_p3 = pnand %p2548_p2, %p2542_p13 }
 0x218   :  { %2552 = shalt.err (!%p2549_p3)  }
 0x219   :  { %73 = dma.hbm_to_vmem [thread:$0]  %s2978_s5, 4096, %s71_s12, [#allocation3]  ;;  %2351 = vtanh.f32 %v2705_v42  ;;  %v2350_v43 = vpop.eup %2349  ;;  %vm313_vm3 = vcmask 1041409  }
 0x21a   :  { %291 = vrot.lane.b32.xlu0 %v2350_v43, %s2591_s10 }
 0x223   :  { %v2352_v44 = vpop.eup %2351 }
 0x224   :  { %293 = vrot.lane.b32.xlu1 %v2352_v44, %s2591_s10 }
 0x28c   :  { %v292_v45 = vpop.permute.xlu0 %291 }
 0x28d   :  { %v297_v46 = vmul.f32 %v2346_v31, %v292_v45 }
 0x296   :  { %v294_v47 = vpop.permute.xlu1 %293 }
 0x297   :  { %v298_v48 = vmul.f32 %v2348_v34, %v294_v47 }
 0x299   :  { %v312_v49 = vrot.slane %v298_v48, 7 }
 0x29a   :  { %2579 = dma.done.wait [#allocation3], 4096 }
 0x29b   :  { %2580 = vsyncadd [#allocation3], 4294963200  ;;  %2235 = vmatprep.subr.bf16.mxu0 %v2588_v0  ;;  %2068 = vmatprep.mubr.msk.f32.mxu0 %vm2589_vm1, %v2590_v1  ;;  %v314_v50 = vsel %vm313_vm3, %v312_v49, %v297_v46  ;;  %v306_v51 = vld [vmem:[#allocation9] sm:$0xff]  ;;  %v307_v52 = vld [vmem:[#allocation9 + $0x8] sm:$0xff]  ;;  %v412_v25 = vrot.slane %v2705_v42, 7  ;;  %v411_v26 = vrot.slane %v2702_v39, 7 }
 0x29c   :  { %2241 = vmatprep.subr.bf16.mxu1 %v2588_v0  ;;  %2079 = vmatprep.mubr.msk.f32.mxu1 %vm2589_vm1, %v2590_v1  ;;  %v308_v53 = vld [vmem:[#allocation9 + $0x10] sm:$0xff]  ;;  %v2730_v54 = vpack.c.bf16 %v307_v52, %v306_v51  ;;  %v309_v55 = vld [vmem:[#allocation9 + $0x18] sm:$0xff]  ;;  %v302_v57 = vld [vmem:[#allocation2] sm:$0xff]  ;;  %s2594_s23 = smov [#allocation10]  }
 0x29d   :  { %315 = vrot.lane.b32.xlu0 %v314_v50, %s2592_s3  ;;  %v2733_v56 = vpack.c.bf16 %v309_v55, %v308_v53  ;;  %v303_v58 = vld [vmem:[#allocation2 + $0x8] sm:$0xff]  ;;  %v304_v60 = vld [vmem:[#allocation2 + $0x10] sm:$0xff]  ;;  %v305_v61 = vld [vmem:[#allocation2 + $0x18] sm:$0xff]  ;;  %s1906_s25 = sshll.u32 %s2594_s23, 4  ;;  %s1907_s25 = int_to_ptr.vmem [resolvable:$true] %s1906_s25 }
 0x29e   :  { %2237 = vmatpush3.bf16.msra.mxu0 %v2730_v54  ;;  %v2248_v59 = vpack.c.bf16 %v303_v58, %v302_v57  ;;  %v2251_v63 = vpack.c.bf16 %v305_v61, %v304_v60  ;;  %v449_v33 = vld [vmem:[#allocation2 + $0x20] sm:$0xff]  ;;  %v450_v34 = vld [vmem:[#allocation2 + $0x28] sm:$0xff]  ;;  %v451_v35 = vld [vmem:[#allocation2 + $0x30] sm:$0xff]  ;;  %s2553_s26 = scalar_lea.vmem %s1907_s25, 32  ;;  %p2558_p5 = scmp.lt.s32.totalorder %s1907_s25, %s1907_s25 }
 0x29f   :  { %2238 = vmatprep.subr.bf16.mxu0 %v2588_v0  ;;  %v2242_v36 = vpack.c.bf16 %v450_v34, %v449_v33  ;;  %v452_v37 = vld [vmem:[#allocation2 + $0x38] sm:$0xff]  ;;  %p2554_p4 = scmp.ne.s32.totalorder %s1907_s25, %s2553_s26  ;;  %p2559_p6 = scmp.lt.s32.totalorder %s2553_s26, %s2553_s26 }
 0x2a0   :  { %v2245_v38 = vpack.c.bf16 %v452_v37, %v451_v35 }
 0x2a1   :  { %2243 = vmatpush3.bf16.msra.mxu1 %v2242_v36  ;;  %p2560_p7 = por %p2559_p6, %p2558_p5 }
 0x2a2   :  { %2240 = vmatpush3.bf16.msra.mxu0 %v2733_v56  ;;  %2244 = vmatprep.subr.bf16.mxu1 %v2588_v0 }
 0x2a3   :  { %2247 = vmatprep.subr.bf16.mxu0 %v2588_v0  ;;  %p2561_p8 = pnand %p2560_p7, %p2554_p4 }
 0x2a5   :  { %2246 = vmatpush3.bf16.msra.mxu1 %v2245_v38 }
 0x2a6   :  { %2253 = vmatprep.subr.bf16.mxu1 %v2588_v0 }
 0x30f   :  { %v316_v62 = vpop.permute.xlu0 %315 }
 0x310   :  { %2069 = vmatmul.mubr.msk.f32.vlgmr.msra.gmra.mrb[2].mxu0 %vm171_vm0, %v316_v62 }
 0x311   :  { %2249 = vmatpush3.bf16.msra.mxu0 %v2248_v59  ;;  %2090 = vmatprep.mubr.msk.f32.mxu0 %vm2589_vm1, %v2590_v1 }
 0x312   :  { %2250 = vmatprep.subr.bf16.mxu0 %v2588_v0 }
 0x315   :  { %2252 = vmatpush3.bf16.msra.mxu0 %v2251_v63 }
 0x316   :  { %2259 = vmatprep.subr.bf16.mxu0 %v2588_v0 }
 0x318   :  { %2091 = vmatmul.mubr.msk.f32.vlgmr.msra.gmra.mrb[4].mxu0 %vm171_vm0, %v316_v62 }
 0x319   :  { %2112 = vmatprep.mubr.msk.f32.mxu0 %vm2589_vm1, %v2590_v1 }
 0x3e3   :  { %v385_v2 = vpop.f32.mrb[2].mxu0 }
 0x3e4   :  { %v390_v3 = vrot.slane %v385_v2, 7  ;;  %v394_v4 = vadd.f32 %v385_v2, %v2694_v18  ;;  %v2070_v5 = vpop.f32.mrb[3].mxu0 }
 0x3e6   :  { %v393_v6 = vadd.f32 %v390_v3, %v2692_v16  ;;  %2353 = vtanh.f32 %v394_v4  ;;  %v1929_v11 = vmul.f32 -1.442695, %v394_v4 }
 0x3e8   :  { %2355 = vtanh.f32 %v393_v6  ;;  %v1928_v12 = vmul.f32 -1.442695, %v393_v6 }
 0x3e9   :  { %2357 = vpow2.f32 %v1929_v11 }
 0x3ea   :  { %2359 = vpow2.f32 %v1928_v12 }
 0x3eb   :  { %v2748_v7 = vpop.f32.mrb[4].mxu0 }
 0x3ec   :  { %v2092_v8 = vpop.f32.mrb[5].mxu0 }
 0x3f0   :  { %v2354_v9 = vpop.eup %2353 }
 0x3f1   :  { %421 = vrot.lane.b32.xlu1 %v2354_v9, %s2591_s10 }
 0x3f2   :  { %v2356_v10 = vpop.eup %2355 }
 0x3f3   :  { %419 = vrot.lane.b32.xlu0 %v2356_v10, %s2591_s10  ;;  %v2358_v13 = vpop.eup %2357 }
 0x3f4   :  { %v2360_v14 = vpop.eup %2359  ;;  %v402_v15 = vadd.f32 1.0, %v2358_v13 }
 0x3f5   :  { %v401_v17 = vadd.f32 1.0, %v2360_v14 }
 0x3f6   :  { %2361 = vrcp.f32 %v402_v15 }
 0x3f7   :  { %2363 = vrcp.f32 %v401_v17 }
 0x400   :  { %v2362_v19 = vpop.eup %2361 }
 0x401   :  { %v2364_v22 = vpop.eup %2363  ;;  %v416_v27 = vmul.f32 %v2362_v19, %v412_v25  ;;  %v735_v25 = vld [vmem:[#allocation2 + $0x58] sm:$0xff] }
 0x402   :  { %v415_v30 = vmul.f32 %v2364_v22, %v411_v26 }
 0x463   :  { %v422_v20 = vpop.permute.xlu1 %421 }
 0x464   :  { %v426_v21 = vmul.f32 %v2362_v19, %v422_v20 }
 0x465   :  { %v420_v23 = vpop.permute.xlu0 %419 }
 0x466   :  { %431 = vrot.lane.b32.xlu0 %v426_v21, %s2592_s3  ;;  %v425_v24 = vmul.f32 %v2364_v22, %v420_v23  ;;  %v732_v21 = vld [vmem:[#allocation2 + $0x40] sm:$0xff]  ;;  %v734_v23 = vld [vmem:[#allocation2 + $0x50] sm:$0xff] }
 0x467   :  { %v2263_v26 = vpack.c.bf16 %v735_v25, %v734_v23 }
 0x468   :  { %429 = vrot.lane.b32.xlu1 %v425_v24, %s2592_s3 }
 0x4d8   :  { %v432_v28 = vpop.permute.xlu0 %431 }
 0x4d9   :  { %v2756_v29 = vadd.f32 %v432_v28, %v416_v27 }
 0x4da   :  { %v430_v31 = vpop.permute.xlu1 %429 }
 0x4db   :  { %2365 = vtanh.f32 %v2756_v29  ;;  %v2759_v32 = vadd.f32 %v430_v31, %v415_v30  ;;  %v695_v12 = vrot.slane %v2756_v29, 7 }
 0x4dd   :  { %2367 = vtanh.f32 %v2759_v32  ;;  %v694_v11 = vrot.slane %v2759_v32, 7 }
 0x4e5   :  { %v2366_v39 = vpop.eup %2365 }
 0x4e6   :  { %443 = vrot.lane.b32.xlu0 %v2366_v39, %s2591_s10 }
 0x4e7   :  { %v2368_v40 = vpop.eup %2367 }
 0x4e8   :  { %441 = vrot.lane.b32.xlu1 %v2368_v40, %s2591_s10 }
 0x558   :  { %v444_v41 = vpop.permute.xlu0 %443 }
 0x559   :  { %v448_v44 = vmul.f32 %v2362_v19, %v444_v41 }
 0x55a   :  { %v442_v42 = vpop.permute.xlu1 %441 }
 0x55b   :  { %v447_v43 = vmul.f32 %v2364_v22, %v442_v42  ;;  %v733_v22 = vld [vmem:[#allocation2 + $0x48] sm:$0xff] }
 0x55c   :  { %v2260_v24 = vpack.c.bf16 %v733_v22, %v732_v21 }
 0x55d   :  { %v455_v45 = vrot.slane %v447_v43, 1 }
 0x55e   :  { %2261 = vmatpush3.bf16.msra.mxu0 %v2260_v24 }
 0x55f   :  { %v456_v46 = vsel %vm313_vm3, %v448_v44, %v455_v45  ;;  %2262 = vmatprep.subr.bf16.mxu0 %v2588_v0 }
 0x560   :  { %457 = vrot.lane.b32.xlu1 %v456_v46, %s2592_s3 }
 0x562   :  { %2264 = vmatpush3.bf16.msra.mxu0 %v2263_v26 }
 0x563   :  { %2271 = vmatprep.subr.bf16.mxu0 %v2588_v0 }
 0x5d2   :  { %v458_v47 = vpop.permute.xlu1 %457 }
 0x5d3   :  { %2080 = vmatmul.mubr.msk.f32.vlgmr.msra.gmra.mrb[2].mxu1 %vm171_vm0, %v458_v47 }
 0x5d4   :  { %2255 = vmatpush3.bf16.msra.mxu1 %v2730_v54  ;;  %2101 = vmatprep.mubr.msk.f32.mxu1 %vm2589_vm1, %v2590_v1 }
 0x5d5   :  { %2256 = vmatprep.subr.bf16.mxu1 %v2588_v0 }
 0x5d8   :  { %2258 = vmatpush3.bf16.msra.mxu1 %v2733_v56 }
 0x5d9   :  { %2265 = vmatprep.subr.bf16.mxu1 %v2588_v0 }
 0x5db   :  { %2102 = vmatmul.mubr.msk.f32.vlgmr.msra.gmra.mrb[4].mxu1 %vm171_vm0, %v458_v47 }
 0x5dc   :  { %2267 = vmatpush3.bf16.msra.mxu1 %v2730_v54  ;;  %2123 = vmatprep.mubr.msk.f32.mxu1 %vm2589_vm1, %v2590_v1 }
 0x5dd   :  { %2268 = vmatprep.subr.bf16.mxu1 %v2588_v0 }
 0x5e0   :  { %2270 = vmatpush3.bf16.msra.mxu1 %v2733_v56 }
 0x5e1   :  { %2277 = vmatprep.subr.bf16.mxu1 %v2588_v0 }
 0x6a6   :  { %v527_v48 = vpop.f32.mrb[2].mxu1 }
 0x6a7   :  { %v2783_v49 = vadd.f32 %v2748_v7, %v527_v48  ;;  %v2081_v50 = vpop.f32.mrb[3].mxu1 }
 0x6ae   :  { %v667_v51 = vpop.f32.mrb[4].mxu1 }
 0x6af   :  { %v672_v52 = vrot.slane %v667_v51, 6  ;;  %v673_v53 = vrot.slane %v667_v51, 7  ;;  %v2103_v55 = vpop.f32.mrb[5].mxu1 }
 0x6b1   :  { %v676_v57 = vadd.f32 %v672_v52, %v2692_v16  ;;  %v677_v58 = vadd.f32 %v673_v53, %v2694_v18 }
 0x6b3   :  { %2369 = vtanh.f32 %v676_v57  ;;  %v1933_v61 = vmul.f32 -1.442695, %v676_v57  ;;  %v1934_v62 = vmul.f32 -1.442695, %v677_v58 }
 0x6b4   :  { %2371 = vtanh.f32 %v677_v58 }
 0x6b5   :  { %2373 = vpow2.f32 %v1933_v61 }
 0x6b6   :  { %2375 = vpow2.f32 %v1934_v62 }
 0x6bd   :  { %v2370_v59 = vpop.eup %2369 }
 0x6be   :  { %v2372_v60 = vpop.eup %2371  ;;  %702 = vrot.lane.b32.xlu0 %v2370_v59, %s2591_s10 }
 0x6bf   :  { %704 = vrot.lane.b32.xlu1 %v2372_v60, %s2591_s10  ;;  %v2374_v63 = vpop.eup %2373 }
 0x6c0   :  { %v2376_v2 = vpop.eup %2375  ;;  %v684_v3 = vadd.f32 1.0, %v2374_v63 }
 0x6c1   :  { %v685_v4 = vadd.f32 1.0, %v2376_v2 }
 0x6c2   :  { %2377 = vrcp.f32 %v684_v3 }
 0x6c3   :  { %2379 = vrcp.f32 %v685_v4 }
 0x6cc   :  { %v2378_v5 = vpop.eup %2377 }
 0x6cd   :  { %v2380_v7 = vpop.eup %2379  ;;  %v698_v13 = vmul.f32 %v2378_v5, %v694_v11 }
 0x6ce   :  { %v699_v14 = vmul.f32 %v2380_v7, %v695_v12  ;;  %v950_v12 = vld [vmem:[#allocation2 + $0x78] sm:$0xff] }
 0x730   :  { %v703_v6 = vpop.permute.xlu0 %702 }
 0x731   :  { %v705_v8 = vpop.permute.xlu1 %704  ;;  %v708_v9 = vmul.f32 %v2378_v5, %v703_v6 }
 0x732   :  { %v709_v10 = vmul.f32 %v2380_v7, %v705_v8  ;;  %v947_v8 = vld [vmem:[#allocation2 + $0x60] sm:$0xff] }
 0x733   :  { %712 = vrot.lane.b32.xlu0 %v708_v9, %s2592_s3  ;;  %v948_v9 = vld [vmem:[#allocation2 + $0x68] sm:$0xff] }
 0x734   :  { %714 = vrot.lane.b32.xlu1 %v709_v10, %s2592_s3  ;;  %v949_v10 = vld [vmem:[#allocation2 + $0x70] sm:$0xff]  ;;  %v2272_v11 = vpack.c.bf16 %v948_v9, %v947_v8 }
 0x7a5   :  { %v713_v15 = vpop.permute.xlu0 %712 }
 0x7a6   :  { %v715_v17 = vpop.permute.xlu1 %714  ;;  %v2793_v19 = vadd.f32 %v713_v15, %v698_v13  ;;  %v2275_v13 = vpack.c.bf16 %v950_v12, %v949_v10 }
 0x7a7   :  { %v2795_v20 = vadd.f32 %v715_v17, %v699_v14 }
 0x7a8   :  { %2381 = vtanh.f32 %v2793_v19  ;;  %v909_v62 = vrot.slane %v2793_v19, 7 }
 0x7a9   :  { %2383 = vtanh.f32 %v2795_v20  ;;  %v910_v63 = vrot.slane %v2795_v20, 7 }
 0x7b2   :  { %v2382_v27 = vpop.eup %2381 }
 0x7b3   :  { %v2384_v28 = vpop.eup %2383  ;;  %724 = vrot.lane.b32.xlu0 %v2382_v27, %s2591_s10 }
 0x7b4   :  { %726 = vrot.lane.b32.xlu1 %v2384_v28, %s2591_s10 }
 0x825   :  { %v725_v29 = vpop.permute.xlu0 %724 }
 0x826   :  { %v727_v30 = vpop.permute.xlu1 %726  ;;  %v730_v31 = vmul.f32 %v2378_v5, %v725_v29 }
 0x827   :  { %v731_v32 = vmul.f32 %v2380_v7, %v727_v30 }
 0x828   :  { %v738_v33 = vrot.slane %v730_v31, 2 }
 0x829   :  { %v739_v34 = vrot.slane %v731_v32, 1 }
 0x82b   :  { %v740_v35 = vsel %vm313_vm3, %v739_v34, %v738_v33 }
 0x82c   :  { %741 = vrot.lane.b32.xlu0 %v740_v35, %s2592_s3 }
 0x89e   :  { %v742_v36 = vpop.permute.xlu0 %741 }
 0x89f   :  { %2113 = vmatmul.mubr.msk.f32.vlgmr.msra.gmra.mrb[6].mxu0 %vm171_vm0, %v742_v36  ;;  %2124 = vmatmul.mubr.msk.f32.vlgmr.msra.gmra.mrb[6].mxu1 %vm171_vm0, %v742_v36 }
 0x8a0   :  { %2279 = vmatpush3.bf16.msra.mxu1 %v2730_v54  ;;  %2145 = vmatprep.mubr.msk.f32.mxu1 %vm2589_vm1, %v2590_v1 }
 0x8a1   :  { %2280 = vmatprep.subr.bf16.mxu1 %v2588_v0  ;;  %2134 = vmatprep.mubr.msk.f32.mxu0 %vm2589_vm1, %v2590_v1 }
 0x8a2   :  { %2273 = vmatpush3.bf16.msra.mxu0 %v2272_v11 }
 0x8a3   :  { %2274 = vmatprep.subr.bf16.mxu0 %v2588_v0 }
 0x8a4   :  { %2282 = vmatpush3.bf16.msra.mxu1 %v2733_v56 }
 0x8a5   :  { %2289 = vmatprep.subr.bf16.mxu1 %v2588_v0 }
 0x8a6   :  { %2276 = vmatpush3.bf16.msra.mxu0 %v2275_v13 }
 0x8a7   :  { %2283 = vmatprep.subr.bf16.mxu0 %v2588_v0 }
 0x972   :  { %v811_v37 = vpop.f32.mrb[6].mxu0  ;;  %v882_v38 = vpop.f32.mrb[6].mxu1 }
 0x973   :  { %v2816_v39 = vadd.f32 %v811_v37, %v2783_v49  ;;  %v887_v40 = vrot.slane %v882_v38, 5  ;;  %v888_v41 = vrot.slane %v882_v38, 6  ;;  %v2114_v42 = vpop.f32.mrb[7].mxu0  ;;  %v2125_v43 = vpop.f32.mrb[7].mxu1 }
 0x975   :  { %v891_v44 = vadd.f32 %v887_v40, %v2692_v16  ;;  %v892_v45 = vadd.f32 %v888_v41, %v2694_v18 }
 0x977   :  { %2385 = vtanh.f32 %v891_v44  ;;  %v1937_v48 = vmul.f32 -1.442695, %v891_v44  ;;  %v1938_v50 = vmul.f32 -1.442695, %v892_v45 }
 0x978   :  { %2387 = vtanh.f32 %v892_v45 }
 0x979   :  { %2389 = vpow2.f32 %v1937_v48 }
 0x97a   :  { %2391 = vpow2.f32 %v1938_v50 }
 0x981   :  { %v2386_v46 = vpop.eup %2385 }
 0x982   :  { %v2388_v47 = vpop.eup %2387  ;;  %917 = vrot.lane.b32.xlu1 %v2386_v46, %s2591_s10 }
 0x983   :  { %919 = vrot.lane.b32.xlu0 %v2388_v47, %s2591_s10  ;;  %v2390_v49 = vpop.eup %2389 }
 0x984   :  { %v2392_v51 = vpop.eup %2391  ;;  %v899_v52 = vadd.f32 1.0, %v2390_v49 }
 0x985   :  { %v900_v53 = vadd.f32 1.0, %v2392_v51 }
 0x986   :  { %2393 = vrcp.f32 %v899_v52 }
 0x987   :  { %2395 = vrcp.f32 %v900_v53 }
 0x990   :  { %v2394_v55 = vpop.eup %2393 }
 0x991   :  { %v2396_v58 = vpop.eup %2395  ;;  %v913_v2 = vmul.f32 %v2394_v55, %v909_v62 }
 0x992   :  { %v914_v3 = vmul.f32 %v2396_v58, %v910_v63  ;;  %v1165_v63 = vld [vmem:[#allocation2 + $0x98] sm:$0xff] }
 0x9f4   :  { %v918_v57 = vpop.permute.xlu1 %917 }
 0x9f5   :  { %v920_v59 = vpop.permute.xlu0 %919  ;;  %v923_v60 = vmul.f32 %v2394_v55, %v918_v57 }
 0x9f6   :  { %v924_v61 = vmul.f32 %v2396_v58, %v920_v59  ;;  %v1162_v59 = vld [vmem:[#allocation2 + $0x80] sm:$0xff] }
 0x9f7   :  { %927 = vrot.lane.b32.xlu1 %v923_v60, %s2592_s3  ;;  %v1163_v60 = vld [vmem:[#allocation2 + $0x88] sm:$0xff] }
 0x9f8   :  { %929 = vrot.lane.b32.xlu0 %v924_v61, %s2592_s3  ;;  %v1164_v61 = vld [vmem:[#allocation2 + $0x90] sm:$0xff]  ;;  %v2284_v62 = vpack.c.bf16 %v1163_v60, %v1162_v59 }
 0xa69   :  { %v928_v4 = vpop.permute.xlu1 %927 }
 0xa6a   :  { %v930_v5 = vpop.permute.xlu0 %929  ;;  %v2826_v6 = vadd.f32 %v928_v4, %v913_v2  ;;  %v2287_v2 = vpack.c.bf16 %v1165_v63, %v1164_v61 }
 0xa6b   :  { %v2828_v7 = vadd.f32 %v930_v5, %v914_v3 }
 0xa6c   :  { %2397 = vtanh.f32 %v2826_v6  ;;  %v1124_v50 = vrot.slane %v2826_v6, 7 }
 0xa6d   :  { %2399 = vtanh.f32 %v2828_v7  ;;  %v1125_v49 = vrot.slane %v2828_v7, 7 }
 0xa76   :  { %v2398_v14 = vpop.eup %2397 }
 0xa77   :  { %v2400_v15 = vpop.eup %2399  ;;  %939 = vrot.lane.b32.xlu1 %v2398_v14, %s2591_s10 }
 0xa78   :  { %941 = vrot.lane.b32.xlu0 %v2400_v15, %s2591_s10 }
 0xae9   :  { %v940_v17 = vpop.permute.xlu1 %939 }
 0xaea   :  { %v942_v19 = vpop.permute.xlu0 %941  ;;  %v945_v20 = vmul.f32 %v2394_v55, %v940_v17 }
 0xaeb   :  { %v946_v21 = vmul.f32 %v2396_v58, %v942_v19 }
 0xaec   :  { %v953_v22 = vrot.slane %v945_v20, 3 }
 0xaed   :  { %v954_v23 = vrot.slane %v946_v21, 2 }
 0xaef   :  { %v955_v24 = vsel %vm313_vm3, %v954_v23, %v953_v22 }
 0xaf0   :  { %956 = vrot.lane.b32.xlu1 %v955_v24, %s2592_s3 }
 0xb62   :  { %v957_v25 = vpop.permute.xlu1 %956 }
 0xb63   :  { %2135 = vmatmul.mubr.msk.f32.vlgmr.msra.gmra.mrb[8].mxu0 %vm171_vm0, %v957_v25  ;;  %2146 = vmatmul.mubr.msk.f32.vlgmr.msra.gmra.mrb[8].mxu1 %vm171_vm0, %v957_v25 }
 0xb64   :  { %2291 = vmatpush3.bf16.msra.mxu1 %v2730_v54  ;;  %2167 = vmatprep.mubr.msk.f32.mxu1 %vm2589_vm1, %v2590_v1 }
 0xb65   :  { %2292 = vmatprep.subr.bf16.mxu1 %v2588_v0  ;;  %2156 = vmatprep.mubr.msk.f32.mxu0 %vm2589_vm1, %v2590_v1 }
 0xb66   :  { %2285 = vmatpush3.bf16.msra.mxu0 %v2284_v62 }
 0xb67   :  { %2286 = vmatprep.subr.bf16.mxu0 %v2588_v0 }
 0xb68   :  { %2294 = vmatpush3.bf16.msra.mxu1 %v2733_v56 }
 0xb69   :  { %2301 = vmatprep.subr.bf16.mxu1 %v2588_v0 }
 0xb6a   :  { %2288 = vmatpush3.bf16.msra.mxu0 %v2287_v2 }
 0xb6b   :  { %2295 = vmatprep.subr.bf16.mxu0 %v2588_v0 }
 0xc36   :  { %v1026_v26 = vpop.f32.mrb[8].mxu0  ;;  %v1097_v27 = vpop.f32.mrb[8].mxu1 }
 0xc37   :  { %v2849_v28 = vadd.f32 %v1026_v26, %v2816_v39  ;;  %v1102_v29 = vrot.slane %v1097_v27, 4  ;;  %v1103_v30 = vrot.slane %v1097_v27, 5  ;;  %v2136_v31 = vpop.f32.mrb[9].mxu0  ;;  %v2147_v32 = vpop.f32.mrb[9].mxu1 }
 0xc39   :  { %v1106_v33 = vadd.f32 %v1102_v29, %v2692_v16  ;;  %v1107_v34 = vadd.f32 %v1103_v30, %v2694_v18 }
 0xc3b   :  { %2401 = vtanh.f32 %v1106_v33  ;;  %v1941_v37 = vmul.f32 -1.442695, %v1106_v33  ;;  %v1942_v38 = vmul.f32 -1.442695, %v1107_v34 }
 0xc3c   :  { %2403 = vtanh.f32 %v1107_v34 }
 0xc3d   :  { %2405 = vpow2.f32 %v1941_v37 }
 0xc3e   :  { %2407 = vpow2.f32 %v1942_v38 }
 0xc45   :  { %v2402_v35 = vpop.eup %2401 }
 0xc46   :  { %v2404_v36 = vpop.eup %2403  ;;  %1132 = vrot.lane.b32.xlu0 %v2402_v35, %s2591_s10 }
 0xc47   :  { %1134 = vrot.lane.b32.xlu1 %v2404_v36, %s2591_s10  ;;  %v2406_v39 = vpop.eup %2405 }
 0xc48   :  { %v2408_v40 = vpop.eup %2407  ;;  %v1114_v41 = vadd.f32 1.0, %v2406_v39 }
 0xc49   :  { %v1115_v42 = vadd.f32 1.0, %v2408_v40 }
 0xc4a   :  { %2409 = vrcp.f32 %v1114_v41 }
 0xc4b   :  { %2411 = vrcp.f32 %v1115_v42 }
 0xc54   :  { %v2410_v43 = vpop.eup %2409 }
 0xc55   :  { %v2412_v45 = vpop.eup %2411  ;;  %v1128_v51 = vmul.f32 %v2410_v43, %v1124_v50 }
 0xc56   :  { %v1129_v52 = vmul.f32 %v2412_v45, %v1125_v49  ;;  %v1380_v49 = vld [vmem:[#allocation2 + $0xb8] sm:$0xff] }
 0xcb8   :  { %v1133_v44 = vpop.permute.xlu0 %1132 }
 0xcb9   :  { %v1135_v46 = vpop.permute.xlu1 %1134  ;;  %v1138_v47 = vmul.f32 %v2410_v43, %v1133_v44 }
 0xcba   :  { %v1139_v48 = vmul.f32 %v2412_v45, %v1135_v46  ;;  %v1377_v46 = vld [vmem:[#allocation2 + $0xa0] sm:$0xff] }
 0xcbb   :  { %1142 = vrot.lane.b32.xlu0 %v1138_v47, %s2592_s3  ;;  %v1378_v47 = vld [vmem:[#allocation2 + $0xa8] sm:$0xff] }
 0xcbc   :  { %1144 = vrot.lane.b32.xlu1 %v1139_v48, %s2592_s3  ;;  %v1379_v48 = vld [vmem:[#allocation2 + $0xb0] sm:$0xff]  ;;  %v2296_v50 = vpack.c.bf16 %v1378_v47, %v1377_v46 }
 0xd2d   :  { %v1143_v53 = vpop.permute.xlu0 %1142 }
 0xd2e   :  { %v1145_v55 = vpop.permute.xlu1 %1144  ;;  %v2859_v57 = vadd.f32 %v1143_v53, %v1128_v51  ;;  %v2299_v51 = vpack.c.bf16 %v1380_v49, %v1379_v48 }
 0xd2f   :  { %v2861_v58 = vadd.f32 %v1145_v55, %v1129_v52 }
 0xd30   :  { %2413 = vtanh.f32 %v2859_v57  ;;  %v1339_v38 = vrot.slane %v2859_v57, 7 }
 0xd31   :  { %2415 = vtanh.f32 %v2861_v58  ;;  %v1340_v39 = vrot.slane %v2861_v58, 7 }
 0xd3a   :  { %v2414_v3 = vpop.eup %2413 }
 0xd3b   :  { %v2416_v4 = vpop.eup %2415  ;;  %1154 = vrot.lane.b32.xlu0 %v2414_v3, %s2591_s10 }
 0xd3c   :  { %1156 = vrot.lane.b32.xlu1 %v2416_v4, %s2591_s10 }
 0xdad   :  { %v1155_v5 = vpop.permute.xlu0 %1154 }
 0xdae   :  { %v1157_v6 = vpop.permute.xlu1 %1156  ;;  %v1160_v7 = vmul.f32 %v2410_v43, %v1155_v5 }
 0xdaf   :  { %v1161_v8 = vmul.f32 %v2412_v45, %v1157_v6 }
 0xdb0   :  { %v1168_v9 = vrot.slane %v1160_v7, 4 }
 0xdb1   :  { %v1169_v10 = vrot.slane %v1161_v8, 3 }
 0xdb3   :  { %v1170_v11 = vsel %vm313_vm3, %v1169_v10, %v1168_v9 }
 0xdb4   :  { %1171 = vrot.lane.b32.xlu0 %v1170_v11, %s2592_s3 }
 0xe26   :  { %v1172_v12 = vpop.permute.xlu0 %1171 }
 0xe27   :  { %2157 = vmatmul.mubr.msk.f32.vlgmr.msra.gmra.mrb[10].mxu0 %vm171_vm0, %v1172_v12  ;;  %2168 = vmatmul.mubr.msk.f32.vlgmr.msra.gmra.mrb[10].mxu1 %vm171_vm0, %v1172_v12 }
 0xe28   :  { %2303 = vmatpush3.bf16.msra.mxu1 %v2730_v54  ;;  %2189 = vmatprep.mubr.msk.f32.mxu1 %vm2589_vm1, %v2590_v1 }
 0xe29   :  { %2304 = vmatprep.subr.bf16.mxu1 %v2588_v0  ;;  %2178 = vmatprep.mubr.msk.f32.mxu0 %vm2589_vm1, %v2590_v1 }
 0xe2a   :  { %2297 = vmatpush3.bf16.msra.mxu0 %v2296_v50 }
 0xe2b   :  { %2298 = vmatprep.subr.bf16.mxu0 %v2588_v0 }
 0xe2c   :  { %2306 = vmatpush3.bf16.msra.mxu1 %v2733_v56 }
 0xe2d   :  { %2313 = vmatprep.subr.bf16.mxu1 %v2588_v0 }
 0xe2e   :  { %2300 = vmatpush3.bf16.msra.mxu0 %v2299_v51 }
 0xe2f   :  { %2307 = vmatprep.subr.bf16.mxu0 %v2588_v0 }
 0xefa   :  { %v1241_v13 = vpop.f32.mrb[10].mxu0  ;;  %v1312_v14 = vpop.f32.mrb[10].mxu1 }
 0xefb   :  { %v2882_v15 = vadd.f32 %v1241_v13, %v2849_v28  ;;  %v1317_v17 = vrot.slane %v1312_v14, 3  ;;  %v1318_v19 = vrot.slane %v1312_v14, 4  ;;  %v2158_v20 = vpop.f32.mrb[11].mxu0  ;;  %v2169_v21 = vpop.f32.mrb[11].mxu1 }
 0xefd   :  { %v1321_v22 = vadd.f32 %v1317_v17, %v2692_v16  ;;  %v1322_v23 = vadd.f32 %v1318_v19, %v2694_v18 }
 0xeff   :  { %2417 = vtanh.f32 %v1321_v22  ;;  %v1945_v26 = vmul.f32 -1.442695, %v1321_v22  ;;  %v1946_v27 = vmul.f32 -1.442695, %v1322_v23 }
 0xf00   :  { %2419 = vtanh.f32 %v1322_v23 }
 0xf01   :  { %2421 = vpow2.f32 %v1945_v26 }
 0xf02   :  { %2423 = vpow2.f32 %v1946_v27 }
 0xf09   :  { %v2418_v24 = vpop.eup %2417 }
 0xf0a   :  { %v2420_v25 = vpop.eup %2419  ;;  %1347 = vrot.lane.b32.xlu1 %v2418_v24, %s2591_s10 }
 0xf0b   :  { %1349 = vrot.lane.b32.xlu0 %v2420_v25, %s2591_s10  ;;  %v2422_v28 = vpop.eup %2421 }
 0xf0c   :  { %v2424_v29 = vpop.eup %2423  ;;  %v1329_v30 = vadd.f32 1.0, %v2422_v28 }
 0xf0d   :  { %v1330_v31 = vadd.f32 1.0, %v2424_v29 }
 0xf0e   :  { %2425 = vrcp.f32 %v1329_v30 }
 0xf0f   :  { %2427 = vrcp.f32 %v1330_v31 }
 0xf18   :  { %v2426_v32 = vpop.eup %2425 }
 0xf19   :  { %v2428_v34 = vpop.eup %2427  ;;  %v1343_v40 = vmul.f32 %v2426_v32, %v1339_v38 }
 0xf1a   :  { %v1344_v41 = vmul.f32 %v2428_v34, %v1340_v39 }
 0xf7c   :  { %v1348_v33 = vpop.permute.xlu1 %1347 }
 0xf7d   :  { %v1350_v35 = vpop.permute.xlu0 %1349  ;;  %v1353_v36 = vmul.f32 %v2426_v32, %v1348_v33  ;;  %v1592_v33 = vld [vmem:[#allocation2 + $0xc0] sm:$0xff] }
 0xf7e   :  { %v1354_v37 = vmul.f32 %v2428_v34, %v1350_v35  ;;  %v1594_v35 = vld [vmem:[#allocation2 + $0xd0] sm:$0xff] }
 0xf7f   :  { %1357 = vrot.lane.b32.xlu1 %v1353_v36, %s2592_s3 }
 0xf80   :  { %1359 = vrot.lane.b32.xlu0 %v1354_v37, %s2592_s3  ;;  %v1595_v37 = vld [vmem:[#allocation2 + $0xd8] sm:$0xff] }
 0xf81   :  { %v2311_v38 = vpack.c.bf16 %v1595_v37, %v1594_v35 }
 0xff1   :  { %v1358_v42 = vpop.permute.xlu1 %1357 }
 0xff2   :  { %v1360_v43 = vpop.permute.xlu0 %1359  ;;  %v2892_v44 = vadd.f32 %v1358_v42, %v1343_v40 }
 0xff3   :  { %v2894_v45 = vadd.f32 %v1360_v43, %v1344_v41 }
 0xff4   :  { %2429 = vtanh.f32 %v2892_v44  ;;  %v1554_v25 = vrot.slane %v2892_v44, 7 }
 0xff5   :  { %2431 = vtanh.f32 %v2894_v45  ;;  %v1555_v26 = vrot.slane %v2894_v45, 7 }
 0xffe   :  { %v2430_v52 = vpop.eup %2429 }
 0xfff   :  { %v2432_v53 = vpop.eup %2431  ;;  %1369 = vrot.lane.b32.xlu1 %v2430_v52, %s2591_s10 }
0x1000   :  { %1371 = vrot.lane.b32.xlu0 %v2432_v53, %s2591_s10 }
0x1071   :  { %v1370_v55 = vpop.permute.xlu1 %1369 }
0x1072   :  { %v1372_v57 = vpop.permute.xlu0 %1371  ;;  %v1375_v58 = vmul.f32 %v2426_v32, %v1370_v55 }
0x1073   :  { %v1376_v59 = vmul.f32 %v2428_v34, %v1372_v57  ;;  %v1593_v34 = vld [vmem:[#allocation2 + $0xc8] sm:$0xff] }
0x1074   :  { %v1383_v60 = vrot.slane %v1375_v58, 5  ;;  %v2308_v36 = vpack.c.bf16 %v1593_v34, %v1592_v33  ;;  %v1956_v33 = vld [vmem:[%s2977_s4] ss:$0 sm:$0xff] }
0x1075   :  { %v1384_v61 = vrot.slane %v1376_v59, 4 }
0x1077   :  { %v1385_v62 = vsel %vm313_vm3, %v1384_v61, %v1383_v60 }
0x1078   :  { %1386 = vrot.lane.b32.xlu1 %v1385_v62, %s2592_s3 }
0x10ea   :  { %v1387_v63 = vpop.permute.xlu1 %1386 }
0x10eb   :  { %2179 = vmatmul.mubr.msk.f32.vlgmr.msra.gmra.mrb[12].mxu0 %vm171_vm0, %v1387_v63  ;;  %2190 = vmatmul.mubr.msk.f32.vlgmr.msra.gmra.mrb[12].mxu1 %vm171_vm0, %v1387_v63 }
0x10ec   :  { %2315 = vmatpush3.bf16.msra.mxu1 %v2730_v54  ;;  %2211 = vmatprep.mubr.msk.f32.mxu1 %vm2589_vm1, %v2590_v1 }
0x10ed   :  { %2316 = vmatprep.subr.bf16.mxu1 %v2588_v0  ;;  %2200 = vmatprep.mubr.msk.f32.mxu0 %vm2589_vm1, %v2590_v1 }
0x10ee   :  { %2309 = vmatpush3.bf16.msra.mxu0 %v2308_v36 }
0x10ef   :  { %2310 = vmatprep.subr.bf16.mxu0 %v2588_v0 }
0x10f0   :  { %2318 = vmatpush3.bf16.msra.mxu1 %v2733_v56 }
0x10f2   :  { %2312 = vmatpush3.bf16.msra.mxu0 %v2311_v38 }
0x10f3   :  { %2319 = vmatprep.subr.bf16.mxu0 %v2588_v0 }
0x11be   :  { %v1456_v2 = vpop.f32.mrb[12].mxu0  ;;  %v1527_v3 = vpop.f32.mrb[12].mxu1 }
0x11bf   :  { %v2914_v4 = vadd.f32 %v1456_v2, %v2882_v15  ;;  %v1532_v5 = vrot.slane %v1527_v3, 2  ;;  %v1533_v6 = vrot.slane %v1527_v3, 3  ;;  %v2180_v7 = vpop.f32.mrb[13].mxu0  ;;  %v2191_v8 = vpop.f32.mrb[13].mxu1 }
0x11c1   :  { %v1536_v54 = vadd.f32 %v1532_v5, %v2692_v16  ;;  %v1537_v9 = vadd.f32 %v1533_v6, %v2694_v18 }
0x11c3   :  { %2433 = vtanh.f32 %v1536_v54  ;;  %v1949_v56 = vmul.f32 -1.442695, %v1536_v54  ;;  %v1950_v12 = vmul.f32 -1.442695, %v1537_v9 }
0x11c4   :  { %2435 = vtanh.f32 %v1537_v9 }
0x11c5   :  { %2437 = vpow2.f32 %v1949_v56 }
0x11c6   :  { %2439 = vpow2.f32 %v1950_v12 }
0x11cd   :  { %v2434_v10 = vpop.eup %2433 }
0x11ce   :  { %v2436_v11 = vpop.eup %2435  ;;  %1562 = vrot.lane.b32.xlu0 %v2434_v10, %s2591_s10 }
0x11cf   :  { %1564 = vrot.lane.b32.xlu1 %v2436_v11, %s2591_s10  ;;  %v2438_v13 = vpop.eup %2437 }
0x11d0   :  { %v2440_v14 = vpop.eup %2439  ;;  %v1544_v15 = vadd.f32 1.0, %v2438_v13 }
0x11d1   :  { %v1545_v17 = vadd.f32 1.0, %v2440_v14 }
0x11d2   :  { %2441 = vrcp.f32 %v1544_v15  ;;  %v1807_v15 = vld [vmem:[#allocation2 + $0xe0] sm:$0xff] }
0x11d3   :  { %2443 = vrcp.f32 %v1545_v17  ;;  %v1808_v17 = vld [vmem:[#allocation2 + $0xe8] sm:$0xff] }
0x11dc   :  { %v2442_v19 = vpop.eup %2441 }
0x11dd   :  { %v2444_v21 = vpop.eup %2443  ;;  %v1558_v27 = vmul.f32 %v2442_v19, %v1554_v25 }
0x11de   :  { %v1559_v28 = vmul.f32 %v2444_v21, %v1555_v26 }
0x1240   :  { %v1563_v20 = vpop.permute.xlu0 %1562 }
0x1241   :  { %v1565_v22 = vpop.permute.xlu1 %1564  ;;  %v1568_v23 = vmul.f32 %v2442_v19, %v1563_v20  ;;  %v2320_v20 = vpack.c.bf16 %v1808_v17, %v1807_v15 }
0x1242   :  { %v1569_v24 = vmul.f32 %v2444_v21, %v1565_v22 }
0x1243   :  { %1572 = vrot.lane.b32.xlu0 %v1568_v23, %s2592_s3 }
0x1244   :  { %1574 = vrot.lane.b32.xlu1 %v1569_v24, %s2592_s3 }
0x12b5   :  { %v1573_v29 = vpop.permute.xlu0 %1572 }
0x12b6   :  { %v1575_v30 = vpop.permute.xlu1 %1574  ;;  %v2924_v31 = vadd.f32 %v1573_v29, %v1558_v27 }
0x12b7   :  { %v2926_v32 = vadd.f32 %v1575_v30, %v1559_v28 }
0x12b8   :  { %2445 = vtanh.f32 %v2924_v31  ;;  %v1769_v54 = vrot.slane %v2924_v31, 7 }
0x12b9   :  { %2447 = vtanh.f32 %v2926_v32  ;;  %v1770_v9 = vrot.slane %v2926_v32, 7 }
0x12c2   :  { %v2446_v39 = vpop.eup %2445 }
0x12c3   :  { %v2448_v40 = vpop.eup %2447  ;;  %1584 = vrot.lane.b32.xlu0 %v2446_v39, %s2591_s10 }
0x12c4   :  { %1586 = vrot.lane.b32.xlu1 %v2448_v40, %s2591_s10 }
0x1335   :  { %v1585_v41 = vpop.permute.xlu0 %1584 }
0x1336   :  { %v1587_v42 = vpop.permute.xlu1 %1586  ;;  %v1590_v43 = vmul.f32 %v2442_v19, %v1585_v41  ;;  %v1809_v19 = vld [vmem:[#allocation2 + $0xf0] sm:$0xff] }
0x1337   :  { %v1591_v44 = vmul.f32 %v2444_v21, %v1587_v42  ;;  %v1810_v21 = vld [vmem:[#allocation2 + $0xf8] sm:$0xff] }
0x1338   :  { %v1598_v45 = vrot.slane %v1590_v43, 6  ;;  %v2323_v22 = vpack.c.bf16 %v1810_v21, %v1809_v19 }
0x1339   :  { %v1599_v46 = vrot.slane %v1591_v44, 5 }
0x133b   :  { %v1600_v47 = vsel %vm313_vm3, %v1599_v46, %v1598_v45 }
0x133c   :  { %1601 = vrot.lane.b32.xlu0 %v1600_v47, %s2592_s3 }
0x13ae   :  { %v1602_v48 = vpop.permute.xlu0 %1601 }
0x13af   :  { %2201 = vmatmul.mubr.msk.f32.vlgmr.msra.gmra.mrb[14].mxu0 %vm171_vm0, %v1602_v48  ;;  %2212 = vmatmul.mubr.msk.f32.vlgmr.msra.gmra.mrb[14].mxu1 %vm171_vm0, %v1602_v48 }
0x13b0   :  { %2222 = vmatprep.mubr.msk.f32.mxu0 %vm2589_vm1, %v2590_v1  ;;  %2321 = vmatpush3.bf16.msra.mxu0 %v2320_v20 }
0x13b1   :  { %2322 = vmatprep.subr.bf16.mxu0 %v2588_v0 }
0x13b4   :  { %2324 = vmatpush3.bf16.msra.mxu0 %v2323_v22 }
0x1482   :  { %v1671_v50 = vpop.f32.mrb[14].mxu0  ;;  %v1742_v49 = vpop.f32.mrb[14].mxu1 }
0x1483   :  { %v2941_v51 = vadd.f32 %v1671_v50, %v2914_v4  ;;  %v1747_v52 = vrot.slane %v1742_v49, 1  ;;  %v1748_v53 = vrot.slane %v1742_v49, 2  ;;  %v2202_v55 = vpop.f32.mrb[15].mxu0  ;;  %v2213_v57 = vpop.f32.mrb[15].mxu1 }
0x1485   :  { %v1751_v58 = vadd.f32 %v1747_v52, %v2692_v16  ;;  %v1752_v59 = vadd.f32 %v1748_v53, %v2694_v18 }
0x1487   :  { %2449 = vtanh.f32 %v1751_v58  ;;  %v1953_v1 = vmul.f32 -1.442695, %v1751_v58  ;;  %v1954_v62 = vmul.f32 -1.442695, %v1752_v59 }
0x1488   :  { %2451 = vtanh.f32 %v1752_v59 }
0x1489   :  { %2453 = vpow2.f32 %v1953_v1 }
0x148a   :  { %2455 = vpow2.f32 %v1954_v62 }
0x1491   :  { %v2450_v60 = vpop.eup %2449 }
0x1492   :  { %v2452_v61 = vpop.eup %2451  ;;  %1777 = vrot.lane.b32.xlu1 %v2450_v60, %s2591_s10 }
0x1493   :  { %1779 = vrot.lane.b32.xlu0 %v2452_v61, %s2591_s10  ;;  %v2454_v63 = vpop.eup %2453 }
0x1494   :  { %v2456_v2 = vpop.eup %2455  ;;  %v1759_v3 = vadd.f32 1.0, %v2454_v63 }
0x1495   :  { %v1760_v4 = vadd.f32 1.0, %v2456_v2 }
0x1496   :  { %2457 = vrcp.f32 %v1759_v3 }
0x1497   :  { %2459 = vrcp.f32 %v1760_v4 }
0x14a0   :  { %v2458_v16 = vpop.eup %2457 }
0x14a1   :  { %v2460_v5 = vpop.eup %2459  ;;  %v1773_v10 = vmul.f32 %v2458_v16, %v1769_v54 }
0x14a2   :  { %v1774_v11 = vmul.f32 %v2460_v5, %v1770_v9 }
0x1504   :  { %v1778_v18 = vpop.permute.xlu1 %1777 }
0x1505   :  { %v1780_v6 = vpop.permute.xlu0 %1779  ;;  %v1783_v7 = vmul.f32 %v2458_v16, %v1778_v18 }
0x1506   :  { %v1784_v8 = vmul.f32 %v2460_v5, %v1780_v6 }
0x1507   :  { %1787 = vrot.lane.b32.xlu1 %v1783_v7, %s2592_s3 }
0x1508   :  { %1789 = vrot.lane.b32.xlu0 %v1784_v8, %s2592_s3 }
0x1579   :  { %v1788_v56 = vpop.permute.xlu1 %1787 }
0x157a   :  { %v1790_v12 = vpop.permute.xlu0 %1789  ;;  %v1793_v13 = vadd.f32 %v1788_v56, %v1773_v10 }
0x157b   :  { %v1794_v14 = vadd.f32 %v1790_v12, %v1774_v11 }
0x157c   :  { %2461 = vtanh.f32 %v1793_v13 }
0x157d   :  { %2463 = vtanh.f32 %v1794_v14 }
0x1586   :  { %v2462_v23 = vpop.eup %2461 }
0x1587   :  { %v2464_v24 = vpop.eup %2463  ;;  %1799 = vrot.lane.b32.xlu1 %v2462_v23, %s2591_s10 }
0x1588   :  { %1801 = vrot.lane.b32.xlu0 %v2464_v24, %s2591_s10 }
0x15f9   :  { %v1800_v25 = vpop.permute.xlu1 %1799 }
0x15fa   :  { %v1802_v26 = vpop.permute.xlu0 %1801  ;;  %v1805_v27 = vmul.f32 %v2458_v16, %v1800_v25 }
0x15fb   :  { %v1806_v28 = vmul.f32 %v2460_v5, %v1802_v26 }
0x15fc   :  { %v1813_v29 = vrot.slane %v1805_v27, 7 }
0x15fd   :  { %v1814_v30 = vrot.slane %v1806_v28, 6 }
0x15ff   :  { %v1815_v31 = vsel %vm313_vm3, %v1814_v30, %v1813_v29 }
0x1600   :  { %1816 = vrot.lane.b32.xlu1 %v1815_v31, %s2592_s3 }
0x1672   :  { %v1817_v32 = vpop.permute.xlu1 %1816 }
0x1673   :  { %2223 = vmatmul.mubr.msk.f32.vlgmr.msra.gmra.mrb[16].mxu0 %vm171_vm0, %v1817_v32 }
0x1746   :  { %v1886_v0 = vpop.f32.mrb[16].mxu0 }
0x1747   :  { %v1890_v34 = vadd.f32 %v1886_v0, %v2941_v51  ;;  %v2224_v35 = vpop.f32.mrb[17].mxu0 }
0x1749   :  { %v1898_v36 = vadd.f32 %v1956_v33, %v1890_v34 }
0x174b   :  { %1899 = vst [vmem:[#allocation10] sm:$0x3] %v1898_v36 }
0x174c   :  { %2564 = shalt.err (!%p2561_p8)
}
0x174d   :  { %s2565_s29 = scalar_lea.hbm %s2979_s6, 32 }
0x174e   :  { %p2566_p9 = scmp.ne.s32.totalorder %s2979_s6, %s2565_s29  ;;  %p2569_p10 = scmp.lt.u32.totalorder %s2565_s29, %s2979_s6 }
0x1750   :  { %p2571_p11 = pnand %p2569_p10, %p2566_p9 }
0x1752   :  { %2574 = shalt.err (!%p2571_p11)
}
0x1753   :  { %1909 = dma.vmem_to_hbm [thread:$0]  %s1907_s25, 32, %s2979_s6, [#allocation6]  }
0x1754   :  { %2581 = dma.done.wait [#allocation6], 32  }
0x1755   :  { %2582 = vsyncadd [#allocation6], 4294967264 }
0x1756   :  { %1913 = vsyncpa [#allocation5], 1 }
0x1757   :  { %1914 = vsyncpa [#allocation8], 1 }
0x1758   :  { %1915 = vsyncpa [#allocation6], 1 }
0x1759   :  { %1916 = vsyncmov [#allocation3] }
0x175c   :  { %s1917_s2 = vpop.sfrf %1916 }
0x175d   :  { %p1957_p12 = scmp.ne.s32.totalorder %s1917_s2, 0 }
0x175f   :  { %1921 = shalt.err (%p1957_p12)  }

</bundles_post_ra>
